<compile_context>
chip_gen: v7x
topology: tpu7x:2x2x1
jax: 0.10.0
libtpu: 0.0.40
codegen_flags: <defaults>
</compile_context>

<pallas_src>
import functools

import jax
import jax.numpy as jnp
from jax.experimental import pallas as pl
from jax.experimental.pallas import tpu as pltpu


_NEG_PAD = -1.0e30   # sigmoid(pad) == 0 and tanh(pad * scale) == -1 exactly


def _round_up(x, m):
    return ((x + m - 1) // m) * m


def _smooth_rank_kernel(srel_ref, scores_ref, out_ref, acc_ref, *,
                        scale, bias, compute_dtype, chunk):
    """Grid = (Bp/bb, Kp/tk, Np/tn); the last grid axis (N) is the reduction axis.

    srel_ref:   (bb, tk)  f32   K on lanes
    scores_ref: (bb, tn)  f32   N on lanes (compact, lane-dense DMA)
    out_ref:    (bb, tk)  f32
    acc_ref:    (bb, tk)  f32   running sum of tanh across all N tiles
    """
    n = pl.program_id(2)

    @pl.when(n == 0)
    def _():
        acc_ref[...] = jnp.zeros_like(acc_ref)

    # Fold 0.5/temp into the 2-D operands (O(bb*tk) + O(bb*tn)) and cast once;
    # on v6e/v7x the 3-D subtract + tanh then run in packed bf16.
    srel_s = (srel_ref[...] * scale).astype(compute_dtype)      # (bb, tk)
    sc_s = (scores_ref[...] * scale).astype(compute_dtype)      # (bb, tn)
    srel_b = srel_s[:, None, :]                                  # (bb, 1, tk)

    tn = sc_s.shape[1]
    acc = jnp.zeros(acc_ref.shape, jnp.float32)

    # Small static sub-chunks keep each expand -> subtract -> tanh -> reduce chain
    # vreg-sized instead of materializing a multi-MiB (bb, tn, tk) intermediate.
    for lo in range(0, tn, chunk):
        hi = min(lo + chunk, tn)
        sc_c = sc_s[:, lo:hi]                                    # (bb, c), N on lanes
        d = sc_c[:, :, None] - srel_b                            # (bb, c, tk)
        t = jnp.tanh(d)
        acc = acc + jnp.sum(t.astype(jnp.float32), axis=1)       # f32 sublane reduce

    acc_ref[...] += acc

    @pl.when(n == pl.num_programs(2) - 1)
    def _():
        # sum_n sigmoid(x) = 0.5 * sum_n tanh(x/2) + 0.5*N ; module adds +0.5.
        # Padded N entries contribute 0.5*(-1) + 0.5 = 0 exactly.
        out_ref[...] = (0.5 * acc_ref[...] + bias).astype(out_ref.dtype)


def _default_compute_dtype():
    try:
        kind = jax.devices()[0].device_kind.lower()
    except Exception:
        return jnp.float32
    # bf16 EUP/VPU only on v6e / v7x; v5e and older stay in f32 (EUP-bound anyway).
    if "v6" in kind or "v7" in kind:
        return jnp.bfloat16
    return jnp.float32


def smooth_rank(scores_max_relevant, scores, *, temp=1.0, compute_dtype=None):
    """Pallas implementation of SmoothRank.forward (any shapes; padding handled)."""
    B, K = scores_max_relevant.shape
    B2, N = scores.shape
    assert B == B2, "batch dims must match"

    if compute_dtype is None:
        compute_dtype = _default_compute_dtype()

    srel = scores_max_relevant.astype(jnp.float32)
    sc = scores.astype(jnp.float32)

    # --- tile selection -------------------------------------------------------
    bb = 8
    Bp = _round_up(B, bb)
    Kp = _round_up(K, 128)
    tk = max(t for t in (512, 384, 256, 128) if Kp % t == 0)
    # Give v7x's second TensorCore something to do when B and K are small.
    if Bp // bb == 1 and Kp // tk == 1 and tk % 256 == 0:
        tk //= 2
    # Sub-chunk size: ~64K elements of (bb, chunk, tk) per chain, multiple of 8.
    chunk = max(8, min(256, (65536 // (bb * tk)) // 8 * 8))
    # N tile: big enough to amortize per-grid-step overhead, bounded unroll.
    tn = min(chunk * 128, _round_up(N, 8))
    Np = _round_up(N, tn)

    # --- padding (cheap XLA-side; padded rows/cols are sliced off / cancel) ----
    if (Bp, Kp) != (B, K):
        srel = jnp.pad(srel, ((0, Bp - B), (0, Kp - K)))
    if (Bp, Np) != (B, N):
        sc = jnp.pad(sc, ((0, Bp - B), (0, Np - N)), constant_values=_NEG_PAD)

    grid = (Bp // bb, Kp // tk, Np // tn)
    scale = 0.5 / float(temp)                 # sigmoid(x) = 0.5*tanh(x/2) + 0.5
    bias = 0.5 * float(Np) + 0.5              # padded N terms contribute exactly 0

    kernel = functools.partial(_smooth_rank_kernel, scale=scale, bias=bias,
                               compute_dtype=compute_dtype, chunk=chunk)

    # --- VMEM budget (all tiles are lane-dense now) ----------------------------
    c = jnp.dtype(compute_dtype).itemsize
    est = (2 * bb * tk * 4                    # srel tile, double-buffered
           + 2 * bb * tn * 4                  # scores tile, double-buffered
           + 2 * bb * tk * 4                  # out tile, double-buffered
           + bb * tk * 4                      # acc scratch
           + bb * tn * (4 + c)                # scaled/cast scores copy
           + bb * tk * (4 + c)                # scaled/cast srel copy
           + bb * chunk * tk * (2 * c + 4)    # per-chunk diff/tanh/upcast
           + bb * tk * 4)                     # f32 carry
    vmem_limit = int(min(max(2 * est, 16 << 20), 48 << 20))   # <=48MiB: safe on v7x

    cost = pl.CostEstimate(
        flops=4 * Bp * Kp * Np,
        transcendentals=Bp * Kp * Np,
        bytes_accessed=4 * (2 * Bp * Kp + Bp * Np * (Kp // tk)))

    out = pl.pallas_call(
        kernel,
        out_shape=jax.ShapeDtypeStruct((Bp, Kp), jnp.float32),
        grid_spec=pltpu.PrefetchScalarGridSpec(
            num_scalar_prefetch=0,
            grid=grid,
            in_specs=[
                pl.BlockSpec((bb, tk), lambda b, k, n: (b, k)),   # scores_max_relevant
                pl.BlockSpec((bb, tn), lambda b, k, n: (b, n)),   # scores (lane-dense)
            ],
            out_specs=pl.BlockSpec((bb, tk), lambda b, k, n: (b, k)),
            scratch_shapes=[pltpu.VMEM((bb, tk), jnp.float32)],
        ),
        compiler_params=pltpu.CompilerParams(
            dimension_semantics=("parallel", "parallel", "arbitrary"),
            vmem_limit_bytes=vmem_limit,
        ),
        cost_estimate=cost,
    )(srel, sc)

    return out[:B, :K]


def smooth_rank_ref(scores_max_relevant, scores, temp=1.0):
    """Pure-JAX reference mirroring the PyTorch forward."""
    x_0 = scores_max_relevant[..., :, None]
    x_1 = scores[..., None, :]
    diff = (x_1 - x_0) / temp
    return jnp.sum(jax.nn.sigmoid(diff), axis=-1) + 0.5


if __name__ == "__main__":
    key = jax.random.PRNGKey(0)
    k1, k2, k3, k4 = jax.random.split(key, 4)

    # Aligned shapes.
    B, K, N = 4, 128, 256
    temp = 1.0
    srel = jax.random.normal(k1, (B, K), dtype=jnp.float32)
    sc = jax.random.normal(k2, (B, N), dtype=jnp.float32)
    ref = smooth_rank_ref(srel, sc, temp=temp)

    # Exact-semantics check: f32 transcendentals everywhere.
    out_f32 = jax.block_until_ready(
        smooth_rank(srel, sc, temp=temp, compute_dtype=jnp.float32))
    assert out_f32.shape == (B, K)
    assert jnp.allclose(out_f32, ref, atol=2e-3, rtol=1e-5), "f32 kernel mismatch"

    # Default fast path (bf16 subtract/tanh on v6e/v7x, f32 accumulate).
    # bf16 tolerance grows ~O(N); N=256 here.
    out = jax.block_until_ready(smooth_rank(srel, sc, temp=temp))
    assert out.shape == (B, K)
    assert jnp.allclose(out, ref, atol=1.5, rtol=2e-2), "default kernel mismatch"

    # Ragged shapes exercising the B/K/N padding path.
    B2, K2, N2 = 3, 37, 101
    srel2 = jax.random.normal(k3, (B2, K2), dtype=jnp.float32)
    sc2 = jax.random.normal(k4, (B2, N2), dtype=jnp.float32)
    ref2 = smooth_rank_ref(srel2, sc2, temp=0.5)
    out2 = jax.block_until_ready(
        smooth_rank(srel2, sc2, temp=0.5, compute_dtype=jnp.float32))
    assert out2.shape == (B2, K2)
    assert jnp.allclose(out2, ref2, atol=2e-3, rtol=1e-5), "ragged kernel mismatch"

    print("KERNEL_OK")
</pallas_src>

<mosaic_0001>
module attributes {stable_mosaic.version = 11 : i64} {
  func.func @_smooth_rank_kernel(%arg0: i32, %arg1: i32, %arg2: i32, %arg3: memref<8x128xf32, #tpu.memory_space<vmem>>, %arg4: memref<8x256xf32, #tpu.memory_space<vmem>>, %arg5: memref<8x128xf32, #tpu.memory_space<vmem>>, %arg6: memref<8x128xf32, #tpu.memory_space<vmem>>) attributes {dimension_semantics = [#tpu.dimension_semantics<parallel>, #tpu.dimension_semantics<parallel>, #tpu.dimension_semantics<arbitrary>], iteration_bounds = array<i64: 1, 1, 1>, scalar_prefetch = 0 : i64, scratch_operands = 1 : i64, tpu.core_type = #tpu.core_type<tc>, window_params = [{transform_indices = @transform_0, window_bounds = array<i64: 8, 128>}, {transform_indices = @transform_1, window_bounds = array<i64: 8, 256>}, {transform_indices = @transform_2, window_bounds = array<i64: 8, 128>}]} {
    %c0_i32 = arith.constant 0 : i32
    %0 = arith.cmpi eq, %arg2, %c0_i32 : i32
    %1 = arith.extui %0 : i1 to i32
    %c0_i32_0 = arith.constant 0 : i32
    %2 = arith.cmpi ne, %1, %c0_i32_0 : i32
    scf.if %2 {
      %cst_16 = arith.constant 0.000000e+00 : f32
      %49 = vector.broadcast %cst_16 : f32 to vector<8x128xf32>
      %c0_17 = arith.constant 0 : index
      %c0_18 = arith.constant 0 : index
      %50 = vector.load %arg6[%c0_17, %c0_18] : memref<8x128xf32, #tpu.memory_space<vmem>>, vector<8x128xf32>
      tpu.vector_store %arg6[%c0_17, %c0_18], %49 {strides = array<i32>} : memref<8x128xf32, #tpu.memory_space<vmem>>, vector<8x128xf32>,
    } else {
    }
    %c0 = arith.constant 0 : index
    %c0_1 = arith.constant 0 : index
    %3 = vector.load %arg3[%c0, %c0_1] : memref<8x128xf32, #tpu.memory_space<vmem>>, vector<8x128xf32>
    %cst = arith.constant 5.000000e-01 : f32
    %4 = vector.broadcast %cst : f32 to vector<8x128xf32>
    %5 = arith.mulf %3, %4 : vector<8x128xf32>
    %c0_2 = arith.constant 0 : index
    %c0_3 = arith.constant 0 : index
    %6 = vector.load %arg4[%c0_2, %c0_3] : memref<8x256xf32, #tpu.memory_space<vmem>>, vector<8x256xf32>
    %cst_4 = arith.constant 5.000000e-01 : f32
    %7 = vector.broadcast %cst_4 : f32 to vector<8x256xf32>
    %8 = arith.mulf %6, %7 : vector<8x256xf32>
    %9 = vector.shape_cast %5 : vector<8x128xf32> to vector<8x1x128xf32>
    %cst_5 = arith.constant 0.000000e+00 : f32
    %10 = vector.broadcast %cst_5 : f32 to vector<8x128xf32>
    %11 = vector.extract_strided_slice %8 {offsets = [0, 0], sizes = [8, 64], strides = [1, 1]} : vector<8x256xf32> to vector<8x64xf32>
    %12 = vector.shape_cast %11 : vector<8x64xf32> to vector<8x64x1xf32>
    %13 = vector.broadcast %12 : vector<8x64x1xf32> to vector<8x64x128xf32>
    %14 = vector.broadcast %9 : vector<8x1x128xf32> to vector<8x64x128xf32>
    %15 = arith.subf %13, %14 : vector<8x64x128xf32>
    %16 = math.tanh %15 : vector<8x64x128xf32>
    %cst_6 = arith.constant dense<0.000000e+00> : vector<8x128xf32>
    %17 = vector.multi_reduction <add>, %16, %cst_6 [1] : vector<8x64x128xf32> to vector<8x128xf32>
    %18 = arith.addf %10, %17 : vector<8x128xf32>
    %19 = vector.extract_strided_slice %8 {offsets = [0, 64], sizes = [8, 64], strides = [1, 1]} : vector<8x256xf32> to vector<8x64xf32>
    %20 = vector.shape_cast %19 : vector<8x64xf32> to vector<8x64x1xf32>
    %21 = vector.broadcast %20 : vector<8x64x1xf32> to vector<8x64x128xf32>
    %22 = vector.broadcast %9 : vector<8x1x128xf32> to vector<8x64x128xf32>
    %23 = arith.subf %21, %22 : vector<8x64x128xf32>
    %24 = math.tanh %23 : vector<8x64x128xf32>
    %cst_7 = arith.constant dense<0.000000e+00> : vector<8x128xf32>
    %25 = vector.multi_reduction <add>, %24, %cst_7 [1] : vector<8x64x128xf32> to vector<8x128xf32>
    %26 = arith.addf %18, %25 : vector<8x128xf32>
    %27 = vector.extract_strided_slice %8 {offsets = [0, 128], sizes = [8, 64], strides = [1, 1]} : vector<8x256xf32> to vector<8x64xf32>
    %28 = vector.shape_cast %27 : vector<8x64xf32> to vector<8x64x1xf32>
    %29 = vector.broadcast %28 : vector<8x64x1xf32> to vector<8x64x128xf32>
    %30 = vector.broadcast %9 : vector<8x1x128xf32> to vector<8x64x128xf32>
    %31 = arith.subf %29, %30 : vector<8x64x128xf32>
    %32 = math.tanh %31 : vector<8x64x128xf32>
    %cst_8 = arith.constant dense<0.000000e+00> : vector<8x128xf32>
    %33 = vector.multi_reduction <add>, %32, %cst_8 [1] : vector<8x64x128xf32> to vector<8x128xf32>
    %34 = arith.addf %26, %33 : vector<8x128xf32>
    %35 = vector.extract_strided_slice %8 {offsets = [0, 192], sizes = [8, 64], strides = [1, 1]} : vector<8x256xf32> to vector<8x64xf32>
    %36 = vector.shape_cast %35 : vector<8x64xf32> to vector<8x64x1xf32>
    %37 = vector.broadcast %36 : vector<8x64x1xf32> to vector<8x64x128xf32>
    %38 = vector.broadcast %9 : vector<8x1x128xf32> to vector<8x64x128xf32>
    %39 = arith.subf %37, %38 : vector<8x64x128xf32>
    %40 = math.tanh %39 : vector<8x64x128xf32>
    %cst_9 = arith.constant dense<0.000000e+00> : vector<8x128xf32>
    %41 = vector.multi_reduction <add>, %40, %cst_9 [1] : vector<8x64x128xf32> to vector<8x128xf32>
    %42 = arith.addf %34, %41 : vector<8x128xf32>
    %c0_10 = arith.constant 0 : index
    %c0_11 = arith.constant 0 : index
    %43 = vector.load %arg6[%c0_10, %c0_11] : memref<8x128xf32, #tpu.memory_space<vmem>>, vector<8x128xf32>
    %44 = arith.addf %43, %42 : vector<8x128xf32>
    %c0_12 = arith.constant 0 : index
    %c0_13 = arith.constant 0 : index
    %45 = vector.load %arg6[%c0_12, %c0_13] : memref<8x128xf32, #tpu.memory_space<vmem>>, vector<8x128xf32>
    tpu.vector_store %arg6[%c0_12, %c0_13], %44 {strides = array<i32>} : memref<8x128xf32, #tpu.memory_space<vmem>>, vector<8x128xf32>,
    %c0_i32_14 = arith.constant 0 : i32
    %46 = arith.cmpi eq, %arg2, %c0_i32_14 : i32
    %47 = arith.extui %46 : i1 to i32
    %c0_i32_15 = arith.constant 0 : i32
    %48 = arith.cmpi ne, %47, %c0_i32_15 : i32
    scf.if %48 {
      %c0_16 = arith.constant 0 : index
      %c0_17 = arith.constant 0 : index
      %49 = vector.load %arg6[%c0_16, %c0_17] : memref<8x128xf32, #tpu.memory_space<vmem>>, vector<8x128xf32>
      %cst_18 = arith.constant 5.000000e-01 : f32
      %50 = vector.broadcast %cst_18 : f32 to vector<8x128xf32>
      %51 = arith.mulf %50, %49 : vector<8x128xf32>
      %cst_19 = arith.constant 1.285000e+02 : f32
      %52 = vector.broadcast %cst_19 : f32 to vector<8x128xf32>
      %53 = arith.addf %51, %52 : vector<8x128xf32>
      %c0_20 = arith.constant 0 : index
      %c0_21 = arith.constant 0 : index
      %54 = vector.load %arg5[%c0_20, %c0_21] : memref<8x128xf32, #tpu.memory_space<vmem>>, vector<8x128xf32>
      tpu.vector_store %arg5[%c0_20, %c0_21], %53 {strides = array<i32>} : memref<8x128xf32, #tpu.memory_space<vmem>>, vector<8x128xf32>,
    } else {
    }
    return
  }
  func.func @transform_0(%arg0: i32, %arg1: i32, %arg2: i32) -> (i32, i32) {
    %c0_i32 = arith.constant 0 : i32
    return %arg0, %arg1 : i32, i32
  }
  func.func @transform_1(%arg0: i32, %arg1: i32, %arg2: i32) -> (i32, i32) {
    %c0_i32 = arith.constant 0 : i32
    return %arg0, %arg2 : i32, i32
  }
  func.func @transform_2(%arg0: i32, %arg1: i32, %arg2: i32) -> (i32, i32) {
    %c0_i32 = arith.constant 0 : i32
    return %arg0, %arg1 : i32, i32
  }
}

</mosaic_0001>

<bundles_post_ra>
// kernel: tpu_custom_call.1
= control target key start
LH: loop header
LB: loop body
LE: loop exit
PB: predicated region body
PF: predicated region fallthrough
CT: control target
= control target key end

     0   :  { %7 = vsyncpa [#allocation4], 0  ;;  %s4309_s0 = inlined_call_operand.hbm [shape: f32[8,128], index: 0, kind: input, shape index: {}]   ;;  %s4310_s1 = inlined_call_operand.hbm [shape: f32[8,256], index: 1, kind: input, shape index: {}]   ;;  %s4311_s2 = inlined_call_operand.hbm [shape: f32[8,128], index: 2, kind: output, shape index: {}]  }
   0x1   :  { %8 = vsyncpa [#allocation7], 0 }
   0x2   :  { %9 = vsyncpa [#allocation5], 0  ;;  %s2806_s9 = smov [#allocation3]   ;;  %s2807_s11 = smov [#allocation6]  }
   0x3   :  { %s16_s10 = sshll.u32 %s2806_s9, 4  ;;  %s26_s12 = sshll.u32 %s2807_s11, 4  ;;  %s17_s10 = int_to_ptr.vmem [resolvable:$true] %s16_s10  ;;  %s27_s12 = int_to_ptr.vmem [resolvable:$true] %s26_s12 }
   0x4   :  { %s2734_s15 = scalar_lea.hbm %s4309_s0, 128 }
   0x5   :  { %p2735_p0 = scmp.ne.s32.totalorder %s4309_s0, %s2734_s15  ;;  %p2738_p1 = scmp.lt.u32.totalorder %s2734_s15, %s4309_s0 }
   0x7   :  { %p2740_p2 = pnand %p2738_p1, %p2735_p0 }
   0x9   :  { %2743 = shalt.err (!%p2740_p2)
}
   0xa   :  { %s2744_s20 = scalar_lea.vmem %s17_s10, 128  ;;  %p2749_p4 = scmp.lt.s32.totalorder %s17_s10, %s17_s10 }
   0xb   :  { %p2745_p3 = scmp.ne.s32.totalorder %s17_s10, %s2744_s20  ;;  %p2750_p5 = scmp.lt.s32.totalorder %s2744_s20, %s2744_s20 }
   0xd   :  { %p2751_p6 = por %p2750_p5, %p2749_p4 }
   0xf   :  { %p2752_p7 = pnand %p2751_p6, %p2745_p3 }
  0x11   :  { %2755 = shalt.err (!%p2752_p7)
}
  0x12   :  { %19 = dma.hbm_to_vmem [thread:$0]  %s4309_s0, 128, %s17_s10, [#allocation4]  }
  0x13   :  { %s2756_s25 = scalar_lea.hbm %s4310_s1, 256 }
  0x14   :  { %p2757_p8 = scmp.ne.s32.totalorder %s4310_s1, %s2756_s25  ;;  %p2760_p9 = scmp.lt.u32.totalorder %s2756_s25, %s4310_s1 }
  0x16   :  { %p2762_p10 = pnand %p2760_p9, %p2757_p8 }
  0x18   :  { %2765 = shalt.err (!%p2762_p10)
}
  0x19   :  { %s2766_s30 = scalar_lea.vmem %s27_s12, 256  ;;  %p2771_p12 = scmp.lt.s32.totalorder %s27_s12, %s27_s12 }
  0x1a   :  { %p2767_p11 = scmp.ne.s32.totalorder %s27_s12, %s2766_s30  ;;  %p2772_p13 = scmp.lt.s32.totalorder %s2766_s30, %s2766_s30 }
  0x1c   :  { %p2773_p0 = por %p2772_p13, %p2771_p12 }
  0x1e   :  { %p2774_p1 = pnand %p2773_p0, %p2767_p11 }
  0x20   :  { %2777 = shalt.err (!%p2774_p1)
}
  0x21   :  { %29 = dma.hbm_to_vmem [thread:$0]  %s4310_s1, 256, %s27_s12, [#allocation7]  }
  0x22   :  { %2800 = dma.done.wait [#allocation4], 128  }
  0x23   :  { %2801 = vsyncadd [#allocation4], 4294967168 }
  0x24   :  { %2802 = dma.done.wait [#allocation7], 256  }
  0x25   :  { %2803 = vsyncadd [#allocation7], 4294967040  ;;  %v52_v0 = vlaneseq  ;;  %v2808_v1 = vmov 1966171168   ;;  %v41_v7 = vld [vmem:[#allocation3] sm:$0xff]  ;;  %v43_v8 = vld [vmem:[#allocation6] sm:$0xff] }
  0x26   :  { %v50_v2 = vunpack.c.l.s4 %v2808_v1  ;;  %v42_v11 = vmul.f32 0.5, %v41_v7  ;;  %v45_v12 = vmul.f32 0.5, %v43_v8  ;;  %v44_v15 = vld [vmem:[#allocation6 + $0x8] sm:$0xff]  ;;  %vm2178_vm0 = vcmask 1041409   ;;  %s2809_s1 = smov [#allocation8]  }
  0x27   :  { %v2849_v3 = vshrl.u32 %v52_v0, 7  ;;  %v2869_v25 = vmul.f32 0.5, %v44_v15  ;;  %vm2180_vm1 = vcmask 1042434   ;;  %vm2182_vm2 = vcmask 1043459   ;;  %s2208_s4 = sshll.u32 %s2809_s1, 4  ;;  %s2209_s4 = int_to_ptr.vmem [resolvable:$true] %s2208_s4 }
  0x28   :  { %v51_v4 = vunpack.c.0.s8 %v50_v2  ;;  %v48_v16 = vcombine.high %v42_v11, %v42_v11  ;;  %vm2184_vm3 = vcmask 1044484   ;;  %vm2186_vm4 = vcmask 1045509   ;;  %s2778_s5 = scalar_lea.vmem %s2209_s4, 128  ;;  %p2783_p3 = scmp.lt.s32.totalorder %s2209_s4, %s2209_s4 }
  0x29   :  { %v2853_v6 = vsub.s32 0, %v2849_v3  ;;  %v239_v9 = vsub.s32 4, %v2849_v3  ;;  %v274_v10 = vsub.s32 5, %v2849_v3  ;;  %v309_v13 = vsub.s32 6, %v2849_v3  ;;  %p2779_p2 = scmp.ne.s32.totalorder %s2209_s4, %s2778_s5  ;;  %p2784_p4 = scmp.lt.s32.totalorder %s2778_s5, %s2778_s5 }
  0x2a   :  { %v54_v5 = vsub.s32 %v51_v4, %v2849_v3  ;;  %v344_v14 = vsub.s32 7, %v2849_v3  ;;  %v4314_v46 = vsub.s32 1, %v2849_v3  ;;  %v4313_v49 = vsub.s32 2, %v2849_v3 }
  0x2b   :  { %v2860_v18 = vrot.slane %v45_v12, %v2853_v6  ;;  %v2862_v19 = vrot.slane %v45_v12, %v239_v9  ;;  %v2864_v20 = vrot.slane %v45_v12, %v274_v10  ;;  %v2866_v24 = vrot.slane %v45_v12, %v309_v13  ;;  %p2785_p5 = por %p2784_p4, %p2783_p3 }
  0x2c   :  { %v55_v17 = vrot.slane %v42_v11, %v54_v5  ;;  %v62_v21 = vrot.slane %v48_v16, %v54_v5  ;;  %v2871_v26 = vrot.slane %v45_v12, %v344_v14  ;;  %v2878_v32 = vrot.slane %v2869_v25, %v239_v9 }
  0x2d   :  { %110 = vbcast.lane.b32.xlu1 %v2860_v18, 272  ;;  %102 = vbcast.lane.b32.xlu0 %v2860_v18, 256  ;;  %v2881_v33 = vrot.slane %v2869_v25, %v274_v10  ;;  %v2894_v40 = vrot.slane %v2869_v25, %v309_v13  ;;  %v2897_v41 = vrot.slane %v2869_v25, %v344_v14  ;;  %v4312_v51 = vsub.s32 3, %v2849_v3  ;;  %p2786_p6 = pnand %p2785_p5, %p2779_p2 }
  0x2e   :  { %v63_v22 = vcombine.high %v55_v17, %v55_v17  ;;  %v71_v23 = vrot.slane %v55_v17, %v54_v5  ;;  %v64_v27 = vcombine.high %v62_v21, %v62_v21  ;;  %v78_v28 = vrot.slane %v62_v21, %v54_v5  ;;  %4329 = vst [vmem:[#allocation12_spill] sm:$0xff] %v2878_v32 }
  0x2f   :  { %v2917_v48 = vrot.slane %v45_v12, %v4314_v46  ;;  %v2930_v50 = vrot.slane %v45_v12, %v4313_v49  ;;  %v2943_v52 = vrot.slane %v45_v12, %v4312_v51  ;;  %vm2188_vm5 = vcmask 1046534  }
  0x30   :  { %v85_v29 = vrot.slane %v63_v22, %v54_v5  ;;  %v93_v30 = vcombine.high %v71_v23, %v71_v23  ;;  %v2875_v31 = vrot.slane %v71_v23, %v2853_v6  ;;  %v92_v34 = vrot.slane %v64_v27, %v54_v5 }
  0x31   :  { %v94_v35 = vcombine.high %v78_v28, %v78_v28  ;;  %114 = vbcast.lane.b32.xlu1 %v2860_v18, 280  ;;  %v2891_v39 = vrot.slane %v78_v28, %v2853_v6  ;;  %106 = vbcast.lane.b32.xlu0 %v2860_v18, 264  ;;  %vm2190_vm6 = vcmask 1047559  }
  0x32   :  { %v95_v36 = vcombine.high %v85_v29, %v85_v29  ;;  %v2884_v37 = vrot.slane %v85_v29, %v2853_v6  ;;  %v2888_v38 = vrot.slane %v93_v30, %v2853_v6  ;;  %v96_v42 = vcombine.high %v92_v34, %v92_v34 }
  0x33   :  { %v2904_v44 = vrot.slane %v92_v34, %v2853_v6  ;;  %v2907_v45 = vrot.slane %v94_v35, %v2853_v6 }
  0x34   :  { %4330 = vst [vmem:[#allocation13_spill] sm:$0xff] %v2884_v37  ;;  %4331 = vst [vmem:[#allocation14_spill] sm:$0xff] %v2888_v38  ;;  %v2901_v43 = vrot.slane %v95_v36, %v2853_v6  ;;  %v2911_v47 = vrot.slane %v96_v42, %v2853_v6 }
  0x35   :  { %122 = vbcast.lane.b32.xlu1 %v2860_v18, 296  ;;  %118 = vbcast.lane.b32.xlu0 %v2860_v18, 288 }
  0x36   :  { %4332 = vst [vmem:[#allocation15_spill] sm:$0xff] %v2901_v43  ;;  %4333 = vst [vmem:[#allocation16_spill] sm:$0xff] %v2911_v47 }
  0x39   :  { %130 = vbcast.lane.b32.xlu1 %v2860_v18, 312  ;;  %126 = vbcast.lane.b32.xlu0 %v2860_v18, 304 }
  0x3d   :  { %141 = vbcast.lane.b32.xlu1 %v2917_v48, 264  ;;  %137 = vbcast.lane.b32.xlu0 %v2917_v48, 256 }
  0x41   :  { %149 = vbcast.lane.b32.xlu1 %v2917_v48, 280  ;;  %145 = vbcast.lane.b32.xlu0 %v2917_v48, 272 }
  0x45   :  { %157 = vbcast.lane.b32.xlu1 %v2917_v48, 296  ;;  %153 = vbcast.lane.b32.xlu0 %v2917_v48, 288 }
  0x49   :  { %165 = vbcast.lane.b32.xlu1 %v2917_v48, 312  ;;  %161 = vbcast.lane.b32.xlu0 %v2917_v48, 304 }
  0x4d   :  { %176 = vbcast.lane.b32.xlu1 %v2930_v50, 264  ;;  %172 = vbcast.lane.b32.xlu0 %v2930_v50, 256 }
  0x51   :  { %184 = vbcast.lane.b32.xlu1 %v2930_v50, 280  ;;  %180 = vbcast.lane.b32.xlu0 %v2930_v50, 272 }
  0x55   :  { %192 = vbcast.lane.b32.xlu1 %v2930_v50, 296  ;;  %188 = vbcast.lane.b32.xlu0 %v2930_v50, 288 }
  0x59   :  { %200 = vbcast.lane.b32.xlu1 %v2930_v50, 312  ;;  %196 = vbcast.lane.b32.xlu0 %v2930_v50, 304 }
  0x5d   :  { %211 = vbcast.lane.b32.xlu1 %v2943_v52, 264  ;;  %207 = vbcast.lane.b32.xlu0 %v2943_v52, 256 }
  0x61   :  { %219 = vbcast.lane.b32.xlu1 %v2943_v52, 280  ;;  %215 = vbcast.lane.b32.xlu0 %v2943_v52, 272 }
  0x65   :  { %227 = vbcast.lane.b32.xlu1 %v2943_v52, 296  ;;  %223 = vbcast.lane.b32.xlu0 %v2943_v52, 288 }
  0x69   :  { %235 = vbcast.lane.b32.xlu1 %v2943_v52, 312  ;;  %231 = vbcast.lane.b32.xlu0 %v2943_v52, 304 }
  0x6d   :  { %246 = vbcast.lane.b32.xlu1 %v2862_v19, 264  ;;  %242 = vbcast.lane.b32.xlu0 %v2862_v19, 256 }
  0x71   :  { %254 = vbcast.lane.b32.xlu1 %v2862_v19, 280  ;;  %250 = vbcast.lane.b32.xlu0 %v2862_v19, 272 }
  0x75   :  { %262 = vbcast.lane.b32.xlu1 %v2862_v19, 296  ;;  %258 = vbcast.lane.b32.xlu0 %v2862_v19, 288 }
  0x79   :  { %270 = vbcast.lane.b32.xlu1 %v2862_v19, 312  ;;  %266 = vbcast.lane.b32.xlu0 %v2862_v19, 304 }
  0x7d   :  { %281 = vbcast.lane.b32.xlu1 %v2864_v20, 264  ;;  %277 = vbcast.lane.b32.xlu0 %v2864_v20, 256 }
  0x81   :  { %289 = vbcast.lane.b32.xlu1 %v2864_v20, 280  ;;  %285 = vbcast.lane.b32.xlu0 %v2864_v20, 272 }
  0x85   :  { %297 = vbcast.lane.b32.xlu1 %v2864_v20, 296  ;;  %293 = vbcast.lane.b32.xlu0 %v2864_v20, 288 }
  0x89   :  { %305 = vbcast.lane.b32.xlu1 %v2864_v20, 312  ;;  %301 = vbcast.lane.b32.xlu0 %v2864_v20, 304 }
  0x8d   :  { %316 = vbcast.lane.b32.xlu1 %v2866_v24, 264  ;;  %312 = vbcast.lane.b32.xlu0 %v2866_v24, 256 }
  0x91   :  { %324 = vbcast.lane.b32.xlu1 %v2866_v24, 280  ;;  %320 = vbcast.lane.b32.xlu0 %v2866_v24, 272 }
  0x95   :  { %332 = vbcast.lane.b32.xlu1 %v2866_v24, 296  ;;  %328 = vbcast.lane.b32.xlu0 %v2866_v24, 288 }
  0x99   :  { %340 = vbcast.lane.b32.xlu1 %v2866_v24, 312  ;;  %336 = vbcast.lane.b32.xlu0 %v2866_v24, 304 }
  0x9d   :  { %351 = vbcast.lane.b32.xlu1 %v2871_v26, 264  ;;  %347 = vbcast.lane.b32.xlu0 %v2871_v26, 256 }
  0x9f   :  { %v2981_v53 = vpop.permute.xlu1 %110  ;;  %v2983_v54 = vpop.permute.xlu0 %102 }
  0xa1   :  { %359 = vbcast.lane.b32.xlu1 %v2871_v26, 280  ;;  %355 = vbcast.lane.b32.xlu0 %v2871_v26, 272 }
  0xa3   :  { %v2987_v55 = vpop.permute.xlu1 %114  ;;  %v2989_v56 = vpop.permute.xlu0 %106 }
  0xa5   :  { %367 = vbcast.lane.b32.xlu1 %v2871_v26, 296  ;;  %363 = vbcast.lane.b32.xlu0 %v2871_v26, 288 }
  0xa7   :  { %v2993_v57 = vpop.permute.xlu1 %122  ;;  %v2995_v58 = vpop.permute.xlu0 %118 }
  0xa9   :  { %375 = vbcast.lane.b32.xlu1 %v2871_v26, 312  ;;  %371 = vbcast.lane.b32.xlu0 %v2871_v26, 304 }
  0xab   :  { %v2999_v59 = vpop.permute.xlu1 %130  ;;  %v3001_v60 = vpop.permute.xlu0 %126 }
  0xad   :  { %663 = vbcast.lane.b32.xlu1 %v2860_v18, 328  ;;  %659 = vbcast.lane.b32.xlu0 %v2860_v18, 320 }
  0xaf   :  { %v3005_v61 = vpop.permute.xlu1 %141  ;;  %v3007_v62 = vpop.permute.xlu0 %137 }
  0xb1   :  { %671 = vbcast.lane.b32.xlu1 %v2860_v18, 344  ;;  %667 = vbcast.lane.b32.xlu0 %v2860_v18, 336 }
  0xb3   :  { %v3011_v63 = vpop.permute.xlu1 %149  ;;  %v3013_v0 = vpop.permute.xlu0 %145 }
  0xb5   :  { %679 = vbcast.lane.b32.xlu1 %v2860_v18, 360  ;;  %675 = vbcast.lane.b32.xlu0 %v2860_v18, 352 }
  0xb7   :  { %v3017_v1 = vpop.permute.xlu1 %157  ;;  %v3019_v2 = vpop.permute.xlu0 %153 }
  0xb9   :  { %687 = vbcast.lane.b32.xlu1 %v2860_v18, 376  ;;  %683 = vbcast.lane.b32.xlu0 %v2860_v18, 368 }
  0xbb   :  { %v3023_v4 = vpop.permute.xlu1 %165  ;;  %v3025_v5 = vpop.permute.xlu0 %161 }
  0xbd   :  { %695 = vbcast.lane.b32.xlu1 %v2917_v48, 328  ;;  %691 = vbcast.lane.b32.xlu0 %v2917_v48, 320 }
  0xbf   :  { %v3029_v7 = vpop.permute.xlu1 %176  ;;  %v3031_v8 = vpop.permute.xlu0 %172 }
  0xc0   :  { %4334 = vst [vmem:[#allocation17_spill] sm:$0xff] %v3029_v7  ;;  %4335 = vst [vmem:[#allocation18_spill] sm:$0xff] %v3031_v8 }
  0xc1   :  { %703 = vbcast.lane.b32.xlu1 %v2917_v48, 344  ;;  %699 = vbcast.lane.b32.xlu0 %v2917_v48, 336 }
  0xc3   :  { %v3035_v9 = vpop.permute.xlu1 %184  ;;  %v3037_v10 = vpop.permute.xlu0 %180 }
  0xc4   :  { %4336 = vst [vmem:[#allocation19_spill] sm:$0xff] %v3035_v9  ;;  %4337 = vst [vmem:[#allocation20_spill] sm:$0xff] %v3037_v10 }
  0xc5   :  { %711 = vbcast.lane.b32.xlu1 %v2917_v48, 360  ;;  %707 = vbcast.lane.b32.xlu0 %v2917_v48, 352 }
  0xc7   :  { %v3041_v11 = vpop.permute.xlu1 %192  ;;  %v3043_v12 = vpop.permute.xlu0 %188 }
  0xc8   :  { %4338 = vst [vmem:[#allocation21_spill] sm:$0xff] %v3041_v11  ;;  %4339 = vst [vmem:[#allocation22_spill] sm:$0xff] %v3043_v12 }
  0xc9   :  { %719 = vbcast.lane.b32.xlu1 %v2917_v48, 376  ;;  %715 = vbcast.lane.b32.xlu0 %v2917_v48, 368 }
  0xcb   :  { %v3047_v13 = vpop.permute.xlu1 %200  ;;  %v3049_v14 = vpop.permute.xlu0 %196 }
  0xcc   :  { %4340 = vst [vmem:[#allocation23_spill] sm:$0xff] %v3047_v13  ;;  %4341 = vst [vmem:[#allocation24_spill] sm:$0xff] %v3049_v14 }
  0xcd   :  { %727 = vbcast.lane.b32.xlu1 %v2930_v50, 328  ;;  %723 = vbcast.lane.b32.xlu0 %v2930_v50, 320 }
  0xcf   :  { %v3053_v15 = vpop.permute.xlu1 %211  ;;  %v3055_v16 = vpop.permute.xlu0 %207 }
  0xd1   :  { %735 = vbcast.lane.b32.xlu1 %v2930_v50, 344  ;;  %731 = vbcast.lane.b32.xlu0 %v2930_v50, 336 }
  0xd3   :  { %v3059_v17 = vpop.permute.xlu1 %219  ;;  %v3061_v18 = vpop.permute.xlu0 %215 }
  0xd5   :  { %743 = vbcast.lane.b32.xlu1 %v2930_v50, 360  ;;  %739 = vbcast.lane.b32.xlu0 %v2930_v50, 352 }
  0xd7   :  { %v3065_v21 = vpop.permute.xlu1 %227  ;;  %v3067_v22 = vpop.permute.xlu0 %223 }
  0xd9   :  { %751 = vbcast.lane.b32.xlu1 %v2930_v50, 376  ;;  %747 = vbcast.lane.b32.xlu0 %v2930_v50, 368 }
  0xdb   :  { %v3071_v23 = vpop.permute.xlu1 %235  ;;  %v3073_v27 = vpop.permute.xlu0 %231 }
  0xdd   :  { %759 = vbcast.lane.b32.xlu1 %v2943_v52, 328  ;;  %755 = vbcast.lane.b32.xlu0 %v2943_v52, 320 }
  0xdf   :  { %v3077_v28 = vpop.permute.xlu1 %246  ;;  %v3079_v29 = vpop.permute.xlu0 %242 }
  0xe1   :  { %767 = vbcast.lane.b32.xlu1 %v2943_v52, 344  ;;  %763 = vbcast.lane.b32.xlu0 %v2943_v52, 336 }
  0xe3   :  { %v3083_v30 = vpop.permute.xlu1 %254  ;;  %v3085_v34 = vpop.permute.xlu0 %250 }
  0xe5   :  { %775 = vbcast.lane.b32.xlu1 %v2943_v52, 360  ;;  %771 = vbcast.lane.b32.xlu0 %v2943_v52, 352 }
  0xe7   :  { %v3089_v35 = vpop.permute.xlu1 %262  ;;  %v3091_v36 = vpop.permute.xlu0 %258 }
  0xe9   :  { %783 = vbcast.lane.b32.xlu1 %v2943_v52, 376  ;;  %779 = vbcast.lane.b32.xlu0 %v2943_v52, 368 }
  0xeb   :  { %v3095_v42 = vpop.permute.xlu1 %270  ;;  %v3097_v48 = vpop.permute.xlu0 %266 }
  0xed   :  { %791 = vbcast.lane.b32.xlu1 %v2862_v19, 328  ;;  %787 = vbcast.lane.b32.xlu0 %v2862_v19, 320 }
  0xef   :  { %v3101_v50 = vpop.permute.xlu1 %281  ;;  %v3103_v51 = vpop.permute.xlu0 %277 }
  0xf1   :  { %799 = vbcast.lane.b32.xlu1 %v2862_v19, 344  ;;  %795 = vbcast.lane.b32.xlu0 %v2862_v19, 336 }
  0xf3   :  { %v3107_v49 = vpop.permute.xlu1 %289  ;;  %v3109_v46 = vpop.permute.xlu0 %285 }
  0xf5   :  { %807 = vbcast.lane.b32.xlu1 %v2862_v19, 360  ;;  %803 = vbcast.lane.b32.xlu0 %v2862_v19, 352 }
  0xf7   :  { %v3113_v52 = vpop.permute.xlu1 %297  ;;  %v3115_v14 = vpop.permute.xlu0 %293 }
  0xf9   :  { %815 = vbcast.lane.b32.xlu1 %v2862_v19, 376  ;;  %811 = vbcast.lane.b32.xlu0 %v2862_v19, 368 }
  0xfb   :  { %v3119_v13 = vpop.permute.xlu1 %305  ;;  %v3121_v12 = vpop.permute.xlu0 %301 }
  0xfd   :  { %823 = vbcast.lane.b32.xlu1 %v2864_v20, 328  ;;  %819 = vbcast.lane.b32.xlu0 %v2864_v20, 320 }
  0xff   :  { %v3125_v11 = vpop.permute.xlu1 %316  ;;  %v3127_v10 = vpop.permute.xlu0 %312 }
 0x101   :  { %831 = vbcast.lane.b32.xlu1 %v2864_v20, 344  ;;  %827 = vbcast.lane.b32.xlu0 %v2864_v20, 336 }
 0x103   :  { %v3131_v9 = vpop.permute.xlu1 %324  ;;  %v3133_v8 = vpop.permute.xlu0 %320 }
 0x104   :  { %4342 = vst [vmem:[#allocation25_spill] sm:$0xff] %v3131_v9  ;;  %4343 = vst [vmem:[#allocation26_spill] sm:$0xff] %v3133_v8 }
 0x105   :  { %839 = vbcast.lane.b32.xlu1 %v2864_v20, 360  ;;  %835 = vbcast.lane.b32.xlu0 %v2864_v20, 352 }
 0x107   :  { %v3137_v19 = vpop.permute.xlu1 %332  ;;  %v3139_v7 = vpop.permute.xlu0 %328 }
 0x108   :  { %4344 = vst [vmem:[#allocation27_spill] sm:$0xff] %v3137_v19  ;;  %4345 = vst [vmem:[#allocation28_spill] sm:$0xff] %v3139_v7 }
 0x109   :  { %847 = vbcast.lane.b32.xlu1 %v2864_v20, 376  ;;  %843 = vbcast.lane.b32.xlu0 %v2864_v20, 368 }
 0x10b   :  { %v3143_v38 = vpop.permute.xlu1 %340  ;;  %v3145_v47 = vpop.permute.xlu0 %336 }
 0x10c   :  { %4346 = vst [vmem:[#allocation29_spill] sm:$0xff] %v3145_v47 }
 0x10d   :  { %855 = vbcast.lane.b32.xlu1 %v2866_v24, 328  ;;  %851 = vbcast.lane.b32.xlu0 %v2866_v24, 320 }
 0x10f   :  { %v3149_v8 = vpop.permute.xlu1 %351  ;;  %v3151_v9 = vpop.permute.xlu0 %347 }
 0x110   :  { %4347 = vst [vmem:[#allocation30_spill] sm:$0xff] %v3149_v8  ;;  %4348 = vst [vmem:[#allocation31_spill] sm:$0xff] %v3151_v9 }
 0x111   :  { %863 = vbcast.lane.b32.xlu1 %v2866_v24, 344  ;;  %859 = vbcast.lane.b32.xlu0 %v2866_v24, 336 }
 0x113   :  { %v3155_v7 = vpop.permute.xlu1 %359  ;;  %v3157_v19 = vpop.permute.xlu0 %355 }
 0x114   :  { %4349 = vst [vmem:[#allocation32_spill] sm:$0xff] %v3155_v7  ;;  %4350 = vst [vmem:[#allocation33_spill] sm:$0xff] %v3157_v19 }
 0x115   :  { %871 = vbcast.lane.b32.xlu1 %v2866_v24, 360  ;;  %867 = vbcast.lane.b32.xlu0 %v2866_v24, 352 }
 0x117   :  { %v3161_v20 = vpop.permute.xlu1 %367  ;;  %v3163_v47 = vpop.permute.xlu0 %363 }
 0x118   :  { %4351 = vst [vmem:[#allocation34_spill] sm:$0xff] %v3161_v20  ;;  %4352 = vst [vmem:[#allocation35_spill] sm:$0xff] %v3163_v47 }
 0x119   :  { %879 = vbcast.lane.b32.xlu1 %v2866_v24, 376  ;;  %875 = vbcast.lane.b32.xlu0 %v2866_v24, 368 }
 0x11b   :  { %v3167_v9 = vpop.permute.xlu1 %375  ;;  %v3169_v8 = vpop.permute.xlu0 %371 }
 0x11c   :  { %4353 = vst [vmem:[#allocation36_spill] sm:$0xff] %v3167_v9  ;;  %4354 = vst [vmem:[#allocation37_spill] sm:$0xff] %v3169_v8 }
 0x11d   :  { %887 = vbcast.lane.b32.xlu1 %v2871_v26, 328  ;;  %883 = vbcast.lane.b32.xlu0 %v2871_v26, 320 }
 0x11f   :  { %v3173_v19 = vpop.permute.xlu1 %663  ;;  %v3175_v7 = vpop.permute.xlu0 %659 }
 0x120   :  { %4355 = vst [vmem:[#allocation38_spill] sm:$0xff] %v3173_v19  ;;  %4356 = vst [vmem:[#allocation39_spill] sm:$0xff] %v3175_v7  ;;  %v3191_v19 = vrot.slane %v2869_v25, %v2853_v6 }
 0x121   :  { %895 = vbcast.lane.b32.xlu1 %v2871_v26, 344  ;;  %891 = vbcast.lane.b32.xlu0 %v2871_v26, 336 }
 0x123   :  { %v3179_v47 = vpop.permute.xlu1 %671  ;;  %v3181_v20 = vpop.permute.xlu0 %667 }
 0x124   :  { %4357 = vst [vmem:[#allocation40_spill] sm:$0xff] %v3179_v47  ;;  %4358 = vst [vmem:[#allocation41_spill] sm:$0xff] %v3181_v20 }
 0x125   :  { %903 = vbcast.lane.b32.xlu1 %v2871_v26, 360  ;;  %899 = vbcast.lane.b32.xlu0 %v2871_v26, 352 }
 0x127   :  { %v3185_v24 = vpop.permute.xlu1 %679  ;;  %v3187_v8 = vpop.permute.xlu0 %675 }
 0x128   :  { %4359 = vst [vmem:[#allocation42_spill] sm:$0xff] %v3185_v24  ;;  %4360 = vst [vmem:[#allocation43_spill] sm:$0xff] %v3187_v8 }
 0x129   :  { %911 = vbcast.lane.b32.xlu1 %v2871_v26, 376  ;;  %907 = vbcast.lane.b32.xlu0 %v2871_v26, 368 }
 0x12b   :  { %v3195_v7 = vpop.permute.xlu1 %687  ;;  %v3197_v47 = vpop.permute.xlu0 %683 }
 0x12c   :  { %4361 = vst [vmem:[#allocation44_spill] sm:$0xff] %v3195_v7  ;;  %4362 = vst [vmem:[#allocation45_spill] sm:$0xff] %v3197_v47 }
 0x12d   :  { %1162 = vbcast.lane.b32.xlu1 %v3191_v19, 264  ;;  %1158 = vbcast.lane.b32.xlu0 %v3191_v19, 256 }
 0x12f   :  { %v3201_v20 = vpop.permute.xlu1 %695  ;;  %v3203_v24 = vpop.permute.xlu0 %691 }
 0x130   :  { %4363 = vst [vmem:[#allocation46_spill] sm:$0xff] %v3201_v20  ;;  %4364 = vst [vmem:[#allocation47_spill] sm:$0xff] %v3203_v24  ;;  %v4369_v20 = vsub.s32 1, %v2849_v3 }
 0x131   :  { %1170 = vbcast.lane.b32.xlu1 %v3191_v19, 280  ;;  %1166 = vbcast.lane.b32.xlu0 %v3191_v19, 272 }
 0x132   :  { %v3220_v24 = vrot.slane %v2869_v25, %v4369_v20 }
 0x133   :  { %v3207_v6 = vpop.permute.xlu1 %703  ;;  %v3209_v8 = vpop.permute.xlu0 %699 }
 0x134   :  { %4365 = vst [vmem:[#allocation48_spill] sm:$0xff] %v3207_v6  ;;  %4366 = vst [vmem:[#allocation49_spill] sm:$0xff] %v3209_v8 }
 0x135   :  { %1178 = vbcast.lane.b32.xlu1 %v3191_v19, 296  ;;  %1174 = vbcast.lane.b32.xlu0 %v3191_v19, 288  ;;  %4370 = vst [vmem:[#allocation52_spill] sm:$0xff] %v3220_v24 }
 0x137   :  { %v3213_v26 = vpop.permute.xlu1 %711  ;;  %v3215_v7 = vpop.permute.xlu0 %707 }
 0x138   :  { %4367 = vst [vmem:[#allocation50_spill] sm:$0xff] %v3213_v26  ;;  %4368 = vst [vmem:[#allocation51_spill] sm:$0xff] %v3215_v7 }
 0x139   :  { %1186 = vbcast.lane.b32.xlu1 %v3191_v19, 312  ;;  %1182 = vbcast.lane.b32.xlu0 %v3191_v19, 304 }
 0x13b   :  { %v3224_v6 = vpop.permute.xlu1 %719  ;;  %v3226_v8 = vpop.permute.xlu0 %715 }
 0x13c   :  { %4371 = vst [vmem:[#allocation53_spill] sm:$0xff] %v3224_v6  ;;  %4372 = vst [vmem:[#allocation54_spill] sm:$0xff] %v3226_v8 }
 0x13d   :  { %1197 = vbcast.lane.b32.xlu1 %v3220_v24, 264  ;;  %1193 = vbcast.lane.b32.xlu0 %v3220_v24, 256 }
 0x13f   :  { %v3230_v26 = vpop.permute.xlu1 %727  ;;  %v3232_v7 = vpop.permute.xlu0 %723 }
 0x140   :  { %4373 = vst [vmem:[#allocation55_spill] sm:$0xff] %v3230_v26  ;;  %4374 = vst [vmem:[#allocation56_spill] sm:$0xff] %v3232_v7  ;;  %v4379_v26 = vsub.s32 2, %v2849_v3 }
 0x141   :  { %1205 = vbcast.lane.b32.xlu1 %v3220_v24, 280  ;;  %1201 = vbcast.lane.b32.xlu0 %v3220_v24, 272 }
 0x142   :  { %v3249_v7 = vrot.slane %v2869_v25, %v4379_v26 }
 0x143   :  { %v3236_v20 = vpop.permute.xlu1 %735  ;;  %v3238_v47 = vpop.permute.xlu0 %731 }
 0x144   :  { %4375 = vst [vmem:[#allocation57_spill] sm:$0xff] %v3236_v20  ;;  %4376 = vst [vmem:[#allocation58_spill] sm:$0xff] %v3238_v47 }
 0x145   :  { %1213 = vbcast.lane.b32.xlu1 %v3220_v24, 296  ;;  %1209 = vbcast.lane.b32.xlu0 %v3220_v24, 288  ;;  %4380 = vst [vmem:[#allocation61_spill] sm:$0xff] %v3249_v7 }
 0x147   :  { %v3242_v8 = vpop.permute.xlu1 %743  ;;  %v3244_v6 = vpop.permute.xlu0 %739 }
 0x148   :  { %4377 = vst [vmem:[#allocation59_spill] sm:$0xff] %v3242_v8  ;;  %4378 = vst [vmem:[#allocation60_spill] sm:$0xff] %v3244_v6 }
 0x149   :  { %1221 = vbcast.lane.b32.xlu1 %v3220_v24, 312  ;;  %1217 = vbcast.lane.b32.xlu0 %v3220_v24, 304  ;;  %v4388_v24 = vsub.s32 3, %v2849_v3 }
 0x14b   :  { %v3253_v20 = vpop.permute.xlu1 %751  ;;  %v3255_v47 = vpop.permute.xlu0 %747 }
 0x14c   :  { %4381 = vst [vmem:[#allocation62_spill] sm:$0xff] %v3253_v20  ;;  %4382 = vst [vmem:[#allocation63_spill] sm:$0xff] %v3255_v47 }
 0x14d   :  { %1232 = vbcast.lane.b32.xlu1 %v3249_v7, 264  ;;  %1228 = vbcast.lane.b32.xlu0 %v3249_v7, 256 }
 0x14f   :  { %v3259_v8 = vpop.permute.xlu1 %759  ;;  %v3261_v6 = vpop.permute.xlu0 %755 }
 0x150   :  { %4383 = vst [vmem:[#allocation64_spill] sm:$0xff] %v3261_v6  ;;  %v3278_v6 = vrot.slane %v2869_v25, %v4388_v24 }
 0x151   :  { %1240 = vbcast.lane.b32.xlu1 %v3249_v7, 280  ;;  %1236 = vbcast.lane.b32.xlu0 %v3249_v7, 272 }
 0x153   :  { %v3265_v26 = vpop.permute.xlu1 %767  ;;  %v3267_v9 = vpop.permute.xlu0 %763 }
 0x154   :  { %4384 = vst [vmem:[#allocation65_spill] sm:$0xff] %v3265_v26  ;;  %4385 = vst [vmem:[#allocation66_spill] sm:$0xff] %v3267_v9 }
 0x155   :  { %1248 = vbcast.lane.b32.xlu1 %v3249_v7, 296  ;;  %1244 = vbcast.lane.b32.xlu0 %v3249_v7, 288 }
 0x157   :  { %v3271_v20 = vpop.permute.xlu1 %775  ;;  %v3273_v47 = vpop.permute.xlu0 %771 }
 0x158   :  { %4386 = vst [vmem:[#allocation67_spill] sm:$0xff] %v3271_v20  ;;  %4387 = vst [vmem:[#allocation68_spill] sm:$0xff] %v3273_v47 }
 0x159   :  { %1256 = vbcast.lane.b32.xlu1 %v3249_v7, 312  ;;  %1252 = vbcast.lane.b32.xlu0 %v3249_v7, 304 }
 0x15b   :  { %v3282_v26 = vpop.permute.xlu1 %783  ;;  %v3284_v9 = vpop.permute.xlu0 %779 }
 0x15c   :  { %4389 = vst [vmem:[#allocation69_spill] sm:$0xff] %v3282_v26  ;;  %4390 = vst [vmem:[#allocation70_spill] sm:$0xff] %v3284_v9 }
 0x15d   :  { %1267 = vbcast.lane.b32.xlu1 %v3278_v6, 264  ;;  %1263 = vbcast.lane.b32.xlu0 %v3278_v6, 256 }
 0x15f   :  { %v3288_v20 = vpop.permute.xlu1 %791  ;;  %v3290_v47 = vpop.permute.xlu0 %787 }
 0x161   :  { %1275 = vbcast.lane.b32.xlu1 %v3278_v6, 280  ;;  %1271 = vbcast.lane.b32.xlu0 %v3278_v6, 272 }
 0x163   :  { %v3294_v3 = vpop.permute.xlu1 %799  ;;  %v3296_v25 = vpop.permute.xlu0 %795 }
 0x164   :  { %4391 = vst [vmem:[#allocation71_spill] sm:$0xff] %v3294_v3  ;;  %4392 = vst [vmem:[#allocation72_spill] sm:$0xff] %v3296_v25 }
 0x165   :  { %1283 = vbcast.lane.b32.xlu1 %v3278_v6, 296  ;;  %1279 = vbcast.lane.b32.xlu0 %v3278_v6, 288 }
 0x167   :  { %v3300_v24 = vpop.permute.xlu1 %807  ;;  %v3302_v26 = vpop.permute.xlu0 %803 }
 0x168   :  { %4393 = vst [vmem:[#allocation73_spill] sm:$0xff] %v3300_v24  ;;  %4394 = vst [vmem:[#allocation74_spill] sm:$0xff] %v3302_v26 }
 0x169   :  { %1291 = vbcast.lane.b32.xlu1 %v3278_v6, 312  ;;  %1287 = vbcast.lane.b32.xlu0 %v3278_v6, 304 }
 0x16b   :  { %v3306_v9 = vpop.permute.xlu1 %815  ;;  %v3308_v7 = vpop.permute.xlu0 %811 }
 0x16c   :  { %4395 = vst [vmem:[#allocation75_spill] sm:$0xff] %v3306_v9  ;;  %4396 = vst [vmem:[#allocation76_spill] sm:$0xff] %v3308_v7 }
 0x16d   :  { %1302 = vbcast.lane.b32.xlu1 %v2878_v32, 264  ;;  %1298 = vbcast.lane.b32.xlu0 %v2878_v32, 256 }
 0x16f   :  { %v3312_v3 = vpop.permute.xlu1 %823  ;;  %v3314_v25 = vpop.permute.xlu0 %819 }
 0x170   :  { %4397 = vst [vmem:[#allocation77_spill] sm:$0xff] %v3312_v3  ;;  %4398 = vst [vmem:[#allocation78_spill] sm:$0xff] %v3314_v25 }
 0x171   :  { %1310 = vbcast.lane.b32.xlu1 %v2878_v32, 280  ;;  %1306 = vbcast.lane.b32.xlu0 %v2878_v32, 272 }
 0x173   :  { %v3318_v24 = vpop.permute.xlu1 %831  ;;  %v3320_v26 = vpop.permute.xlu0 %827 }
 0x174   :  { %4399 = vst [vmem:[#allocation79_spill] sm:$0xff] %v3318_v24  ;;  %4400 = vst [vmem:[#allocation80_spill] sm:$0xff] %v3320_v26 }
 0x175   :  { %1318 = vbcast.lane.b32.xlu1 %v2878_v32, 296  ;;  %1314 = vbcast.lane.b32.xlu0 %v2878_v32, 288 }
 0x177   :  { %v3324_v7 = vpop.permute.xlu1 %839  ;;  %v3326_v9 = vpop.permute.xlu0 %835 }
 0x178   :  { %4401 = vst [vmem:[#allocation81_spill] sm:$0xff] %v3324_v7  ;;  %4402 = vst [vmem:[#allocation82_spill] sm:$0xff] %v3326_v9  ;;  %v419_v7 = vsub.f32 %v2981_v53, %v2875_v31  ;;  %v417_v9 = vsub.f32 %v2983_v54, %v2875_v31  ;;  %v422_v53 = vsub.f32 %v2993_v57, %v2875_v31 }
 0x179   :  { %1326 = vbcast.lane.b32.xlu1 %v2878_v32, 312  ;;  %1322 = vbcast.lane.b32.xlu0 %v2878_v32, 304  ;;  %v421_v54 = vsub.f32 %v2995_v58, %v2875_v31  ;;  %v426_v57 = vsub.f32 %v3005_v61, %v2884_v37  ;;  %v425_v58 = vsub.f32 %v3007_v62, %v2884_v37 }
 0x17a   :  { %2222 = vtanh.f32 %v419_v7  ;;  %v430_v61 = vsub.f32 %v3017_v1, %v2884_v37  ;;  %v429_v62 = vsub.f32 %v3019_v2, %v2884_v37  ;;  %v431_v1 = vsub.f32 %v3025_v5, %v2884_v37 }
 0x17b   :  { %v3330_v25 = vpop.permute.xlu1 %847  ;;  %v3332_v3 = vpop.permute.xlu0 %843  ;;  %2224 = vtanh.f32 %v417_v9  ;;  %v442_v2 = vsub.f32 %v3053_v15, %v2901_v43  ;;  %v444_v5 = vsub.f32 %v3059_v17, %v2901_v43  ;;  %v443_v15 = vsub.f32 %v3061_v18, %v2901_v43 }
 0x17c   :  { %4403 = vst [vmem:[#allocation83_spill] sm:$0xff] %v3330_v25  ;;  %4404 = vst [vmem:[#allocation84_spill] sm:$0xff] %v3332_v3  ;;  %v420_v3 = vsub.f32 %v2987_v55, %v2875_v31  ;;  %v424_v55 = vsub.f32 %v2999_v59, %v2875_v31  ;;  %v428_v59 = vsub.f32 %v3011_v63, %v2884_v37 }
 0x17d   :  { %1337 = vbcast.lane.b32.xlu1 %v2881_v33, 264  ;;  %1333 = vbcast.lane.b32.xlu0 %v2881_v33, 256  ;;  %v445_v17 = vsub.f32 %v3067_v22, %v2901_v43  ;;  %v448_v18 = vsub.f32 %v3071_v23, %v2901_v43  ;;  %v450_v22 = vsub.f32 %v3077_v28, %v2891_v39 }
 0x17e   :  { %2226 = vtanh.f32 %v420_v3  ;;  %v449_v23 = vsub.f32 %v3079_v29, %v2891_v39  ;;  %v451_v28 = vsub.f32 %v3085_v34, %v2891_v39  ;;  %v454_v29 = vsub.f32 %v3089_v35, %v2891_v39 }
 0x17f   :  { %v3336_v26 = vpop.permute.xlu1 %855  ;;  %v3338_v24 = vpop.permute.xlu0 %851  ;;  %v456_v34 = vsub.f32 %v3095_v42, %v2891_v39  ;;  %v455_v35 = vsub.f32 %v3097_v48, %v2891_v39  ;;  %v457_v42 = vsub.f32 %v3103_v51, %v2904_v44  ;;  %v460_v48 = vsub.f32 %v3107_v49, %v2904_v44 }
 0x180   :  { %4405 = vst [vmem:[#allocation85_spill] sm:$0xff] %v3336_v26  ;;  %v418_v26 = vsub.f32 %v2989_v56, %v2875_v31  ;;  %v423_v56 = vsub.f32 %v3001_v60, %v2875_v31  ;;  %v427_v60 = vsub.f32 %v3013_v0, %v2884_v37  ;;  %v432_v0 = vsub.f32 %v3023_v4, %v2884_v37 }
 0x181   :  { %1345 = vbcast.lane.b32.xlu1 %v2881_v33, 280  ;;  %1341 = vbcast.lane.b32.xlu0 %v2881_v33, 272  ;;  %v441_v4 = vsub.f32 %v3055_v16, %v2901_v43  ;;  %v446_v16 = vsub.f32 %v3065_v21, %v2901_v43  ;;  %v447_v21 = vsub.f32 %v3073_v27, %v2901_v43 }
 0x182   :  { %2228 = vtanh.f32 %v418_v26  ;;  %v452_v27 = vsub.f32 %v3083_v30, %v2891_v39  ;;  %v453_v30 = vsub.f32 %v3091_v36, %v2891_v39  ;;  %v458_v36 = vsub.f32 %v3101_v50, %v2904_v44 }
 0x183   :  { %v3348_v25 = vpop.permute.xlu1 %863  ;;  %v3352_v32 = vpop.permute.xlu0 %859  ;;  %2230 = vtanh.f32 %v422_v53  ;;  %v459_v50 = vsub.f32 %v3109_v46, %v2904_v44  ;;  %v462_v51 = vsub.f32 %v3113_v52, %v2904_v44  ;;  %v461_v49 = vsub.f32 %v3115_v14, %v2904_v44 }
 0x184   :  { %4406 = vst [vmem:[#allocation86_spill] sm:$0xff] %v3348_v25  ;;  %2232 = vtanh.f32 %v421_v54  ;;  %v3388_v63 = vpop.eup %2222  ;;  %v464_v46 = vsub.f32 %v3119_v13, %v2904_v44  ;;  %v463_v52 = vsub.f32 %v3121_v12, %v2904_v44  ;;  %v466_v14 = vsub.f32 %v3125_v11, %v2907_v45  ;;  %v4431_v12 = vld [vmem:[#allocation25_spill] sm:$0xff]  ;;  %v4433_v11 = vld [vmem:[#allocation26_spill] sm:$0xff] }
 0x185   :  { %1353 = vbcast.lane.b32.xlu1 %v2881_v33, 296  ;;  %1349 = vbcast.lane.b32.xlu0 %v2881_v33, 288  ;;  %2234 = vtanh.f32 %v424_v55  ;;  %v3394_v53 = vpop.eup %2224  ;;  %v465_v13 = vsub.f32 %v3127_v10, %v2907_v45  ;;  %v4435_v10 = vld [vmem:[#allocation27_spill] sm:$0xff] }
 0x186   :  { %2236 = vtanh.f32 %v423_v56 }
 0x187   :  { %v3362_v25 = vpop.permute.xlu1 %871  ;;  %v3366_v7 = vpop.permute.xlu0 %867  ;;  %2238 = vtanh.f32 %v426_v57 }
 0x188   :  { %2240 = vtanh.f32 %v425_v58  ;;  %v3400_v55 = vpop.eup %2226 }
 0x189   :  { %1361 = vbcast.lane.b32.xlu1 %v2881_v33, 312  ;;  %1357 = vbcast.lane.b32.xlu0 %v2881_v33, 304  ;;  %2242 = vtanh.f32 %v428_v59 }
 0x18a   :  { %2244 = vtanh.f32 %v427_v60 }
 0x18b   :  { %v3376_v9 = vpop.permute.xlu1 %879  ;;  %v3380_v26 = vpop.permute.xlu0 %875  ;;  %2246 = vtanh.f32 %v430_v61 }
 0x18c   :  { %v3405_v56 = vpop.eup %2228  ;;  %2248 = vtanh.f32 %v429_v62 }
 0x18d   :  { %1372 = vbcast.lane.b32.xlu1 %v2894_v40, 264  ;;  %1368 = vbcast.lane.b32.xlu0 %v2894_v40, 256  ;;  %v3410_v57 = vpop.eup %2230  ;;  %2250 = vtanh.f32 %v432_v0 }
 0x18e   :  { %4407 = vst [vmem:[#allocation87_spill] sm:$0xff] %v3410_v57  ;;  %v3416_v59 = vpop.eup %2232  ;;  %2252 = vtanh.f32 %v431_v1  ;;  %v467_v57 = vsub.f32 %v4433_v11, %v2907_v45 }
 0x18f   :  { %v3392_v3 = vpop.permute.xlu1 %887  ;;  %v3398_v54 = vpop.permute.xlu0 %883  ;;  %4409 = vst [vmem:[#allocation89_spill] sm:$0xff] %v3416_v59  ;;  %2254 = vtanh.f32 %v442_v2 }
 0x190   :  { %v3422_v61 = vpop.eup %2234  ;;  %2256 = vtanh.f32 %v441_v4 }
 0x191   :  { %1380 = vbcast.lane.b32.xlu1 %v2894_v40, 280  ;;  %1376 = vbcast.lane.b32.xlu0 %v2894_v40, 272  ;;  %4411 = vst [vmem:[#allocation91_spill] sm:$0xff] %v3422_v61  ;;  %v3427_v62 = vpop.eup %2236  ;;  %2258 = vtanh.f32 %v444_v5  ;;  %v468_v61 = vsub.f32 %v4431_v12, %v2907_v45  ;;  %v4436_v12 = vld [vmem:[#allocation28_spill] sm:$0xff] }
 0x192   :  { %4412 = vst [vmem:[#allocation92_spill] sm:$0xff] %v3427_v62  ;;  %v3432_v0 = vpop.eup %2238  ;;  %2260 = vtanh.f32 %v443_v15 }
 0x193   :  { %v3414_v58 = vpop.permute.xlu1 %895  ;;  %v3420_v60 = vpop.permute.xlu0 %891  ;;  %4413 = vst [vmem:[#allocation93_spill] sm:$0xff] %v3432_v0  ;;  %2262 = vtanh.f32 %v446_v16 }
 0x194   :  { %4408 = vst [vmem:[#allocation88_spill] sm:$0xff] %v3414_v58  ;;  %4410 = vst [vmem:[#allocation90_spill] sm:$0xff] %v3420_v60  ;;  %v3438_v2 = vpop.eup %2240  ;;  %2264 = vtanh.f32 %v445_v17 }
 0x195   :  { %1388 = vbcast.lane.b32.xlu1 %v2894_v40, 296  ;;  %1384 = vbcast.lane.b32.xlu0 %v2894_v40, 288  ;;  %4415 = vst [vmem:[#allocation95_spill] sm:$0xff] %v3438_v2  ;;  %v3444_v37 = vpop.eup %2242  ;;  %2266 = vtanh.f32 %v448_v18 }
 0x196   :  { %4417 = vst [vmem:[#allocation97_spill] sm:$0xff] %v3444_v37  ;;  %v3449_v5 = vpop.eup %2244  ;;  %2268 = vtanh.f32 %v447_v21 }
 0x197   :  { %v3436_v1 = vpop.permute.xlu1 %903  ;;  %v3442_v4 = vpop.permute.xlu0 %899  ;;  %4418 = vst [vmem:[#allocation98_spill] sm:$0xff] %v3449_v5  ;;  %2270 = vtanh.f32 %v450_v22 }
 0x198   :  { %4414 = vst [vmem:[#allocation94_spill] sm:$0xff] %v3436_v1  ;;  %4416 = vst [vmem:[#allocation96_spill] sm:$0xff] %v3442_v4  ;;  %v3454_v15 = vpop.eup %2246  ;;  %2272 = vtanh.f32 %v449_v23  ;;  %v4452_v4 = vld [vmem:[#allocation35_spill] sm:$0xff] }
 0x199   :  { %1396 = vbcast.lane.b32.xlu1 %v2894_v40, 312  ;;  %1392 = vbcast.lane.b32.xlu0 %v2894_v40, 304  ;;  %4419 = vst [vmem:[#allocation99_spill] sm:$0xff] %v3454_v15  ;;  %v3460_v37 = vpop.eup %2248  ;;  %2274 = vtanh.f32 %v452_v27 }
 0x19a   :  { %4421 = vst [vmem:[#allocation101_spill] sm:$0xff] %v3460_v37  ;;  %v3466_v5 = vpop.eup %2250  ;;  %2276 = vtanh.f32 %v451_v28 }
 0x19b   :  { %v3458_v16 = vpop.permute.xlu1 %911  ;;  %v3464_v17 = vpop.permute.xlu0 %907  ;;  %4423 = vst [vmem:[#allocation103_spill] sm:$0xff] %v3466_v5  ;;  %2278 = vtanh.f32 %v454_v29 }
 0x19c   :  { %4420 = vst [vmem:[#allocation100_spill] sm:$0xff] %v3458_v16  ;;  %4422 = vst [vmem:[#allocation102_spill] sm:$0xff] %v3464_v17  ;;  %v3471_v18 = vpop.eup %2252  ;;  %2280 = vtanh.f32 %v453_v30 }
 0x19d   :  { %1407 = vbcast.lane.b32.xlu1 %v2897_v41, 264  ;;  %4424 = vst [vmem:[#allocation104_spill] sm:$0xff] %v3471_v18  ;;  %1403 = vbcast.lane.b32.xlu0 %v2897_v41, 256  ;;  %v3476_v21 = vpop.eup %2254  ;;  %2282 = vtanh.f32 %v456_v34 }
 0x19e   :  { %v2257_v5 = vpop.eup %2256  ;;  %2284 = vtanh.f32 %v455_v35 }
 0x19f   :  { %v3480_v22 = vpop.permute.xlu1 %1162  ;;  %v3484_v18 = vpop.permute.xlu0 %1158  ;;  %2286 = vtanh.f32 %v458_v36  ;;  %v584_v11 = vadd.f32 %v2257_v5, %v3476_v21  ;;  %v4441_v5 = vld [vmem:[#allocation30_spill] sm:$0xff]  ;;  %v4442_v21 = vld [vmem:[#allocation31_spill] sm:$0xff] }
 0x1a0   :  { %4425 = vst [vmem:[#allocation105_spill] sm:$0xff] %v3480_v22  ;;  %4426 = vst [vmem:[#allocation106_spill] sm:$0xff] %v3484_v18  ;;  %v3486_v23 = vpop.eup %2258  ;;  %2288 = vtanh.f32 %v457_v42 }
 0x1a1   :  { %1415 = vbcast.lane.b32.xlu1 %v2897_v41, 280  ;;  %v2261_v27 = vpop.eup %2260  ;;  %1411 = vbcast.lane.b32.xlu0 %v2897_v41, 272  ;;  %2290 = vtanh.f32 %v460_v48 }
 0x1a2   :  { %v3494_v28 = vpop.eup %2262  ;;  %2292 = vtanh.f32 %v459_v50  ;;  %v585_v16 = vadd.f32 %v2261_v27, %v584_v11  ;;  %v938_v27 = vsub.f32 %v3259_v8, %v2901_v43 }
 0x1a3   :  { %v3498_v15 = vpop.permute.xlu1 %1170  ;;  %v3500_v29 = vpop.eup %2264  ;;  %2294 = vtanh.f32 %v462_v51 }
 0x1a4   :  { %4427 = vst [vmem:[#allocation107_spill] sm:$0xff] %v3498_v15  ;;  %v3504_v30 = vpop.permute.xlu0 %1166  ;;  %v3506_v37 = vpop.eup %2266  ;;  %2296 = vtanh.f32 %v461_v49 }
 0x1a5   :  { %4428 = vst [vmem:[#allocation108_spill] sm:$0xff] %v3504_v30  ;;  %1423 = vbcast.lane.b32.xlu1 %v2897_v41, 296  ;;  %v3511_v34 = vpop.eup %2268  ;;  %1419 = vbcast.lane.b32.xlu0 %v2897_v41, 288  ;;  %2298 = vtanh.f32 %v464_v46  ;;  %v4440_v30 = vld [vmem:[#allocation16_spill] sm:$0xff] }
 0x1a6   :  { %v3516_v35 = vpop.eup %2270  ;;  %2300 = vtanh.f32 %v463_v52  ;;  %v477_v1 = vsub.f32 %v4452_v4, %v4440_v30 }
 0x1a7   :  { %v3520_v36 = vpop.permute.xlu1 %1178  ;;  %v3522_v2 = vpop.eup %2272  ;;  %2302 = vtanh.f32 %v466_v14  ;;  %v472_v14 = vsub.f32 %v3143_v38, %v2907_v45 }
 0x1a8   :  { %4429 = vst [vmem:[#allocation109_spill] sm:$0xff] %v3520_v36  ;;  %v3526_v42 = vpop.permute.xlu0 %1174  ;;  %v3528_v0 = vpop.eup %2274  ;;  %v470_v36 = vsub.f32 %v4435_v10, %v2907_v45  ;;  %2304 = vtanh.f32 %v465_v13  ;;  %v4438_v13 = vld [vmem:[#allocation29_spill] sm:$0xff]  ;;  %v597_v4 = vadd.f32 %v3522_v2, %v3516_v35  ;;  %v4461_v35 = vld [vmem:[#allocation68_spill] sm:$0xff] }
 0x1a9   :  { %4430 = vst [vmem:[#allocation110_spill] sm:$0xff] %v3526_v42  ;;  %1431 = vbcast.lane.b32.xlu1 %v2897_v41, 312  ;;  %v3533_v48 = vpop.eup %2276  ;;  %1427 = vbcast.lane.b32.xlu0 %v2897_v41, 304  ;;  %2306 = vtanh.f32 %v468_v61  ;;  %v471_v42 = vsub.f32 %v4438_v13, %v2907_v45  ;;  %v474_v61 = vsub.f32 %v4441_v5, %v4440_v30  ;;  %v4444_v5 = vld [vmem:[#allocation64_spill] sm:$0xff] }
 0x1aa   :  { %v3538_v50 = vpop.eup %2278  ;;  %2308 = vtanh.f32 %v467_v57  ;;  %v473_v57 = vsub.f32 %v4442_v21, %v4440_v30  ;;  %v586_v21 = vadd.f32 %v3486_v23, %v585_v16  ;;  %v598_v2 = vadd.f32 %v3533_v48, %v597_v4 }
 0x1ab   :  { %v3542_v51 = vpop.permute.xlu1 %1186  ;;  %v3544_v62 = vpop.eup %2280  ;;  %2310 = vtanh.f32 %v470_v36  ;;  %v945_v48 = vsub.f32 %v3290_v47, %v2891_v39 }
 0x1ac   :  { %4432 = vst [vmem:[#allocation25_spill] sm:$0xff] %v3542_v51  ;;  %v3548_v49 = vpop.permute.xlu0 %1182  ;;  %v3550_v59 = vpop.eup %2282  ;;  %v469_v51 = vsub.f32 %v4436_v12, %v2907_v45 }
 0x1ad   :  { %4434 = vst [vmem:[#allocation26_spill] sm:$0xff] %v3548_v49  ;;  %1679 = vbcast.lane.b32.xlu1 %v3191_v19, 328  ;;  %v3555_v46 = vpop.eup %2284  ;;  %1675 = vbcast.lane.b32.xlu0 %v3191_v19, 320 }
 0x1ae   :  { %v3560_v52 = vpop.eup %2286  ;;  %2312 = vtanh.f32 %v469_v51 }
 0x1af   :  { %v3565_v49 = vpop.permute.xlu1 %1197  ;;  %v3567_v10 = vpop.eup %2288  ;;  %2314 = vtanh.f32 %v472_v14  ;;  %v4446_v14 = vld [vmem:[#allocation32_spill] sm:$0xff] }
 0x1b0   :  { %4437 = vst [vmem:[#allocation27_spill] sm:$0xff] %v3565_v49  ;;  %v3571_v15 = vpop.permute.xlu0 %1193  ;;  %v3573_v12 = vpop.eup %2290  ;;  %2316 = vtanh.f32 %v471_v42  ;;  %v476_v18 = vsub.f32 %v4446_v14, %v4440_v30  ;;  %v4447_v42 = vld [vmem:[#allocation66_spill] sm:$0xff] }
 0x1b1   :  { %4439 = vst [vmem:[#allocation28_spill] sm:$0xff] %v3571_v15  ;;  %1687 = vbcast.lane.b32.xlu1 %v3191_v19, 344  ;;  %v3578_v38 = vpop.eup %2292  ;;  %1683 = vbcast.lane.b32.xlu0 %v3191_v19, 336  ;;  %v937_v15 = vsub.f32 %v4444_v5, %v2901_v43  ;;  %2318 = vtanh.f32 %v474_v61  ;;  %v4450_v61 = vld [vmem:[#allocation34_spill] sm:$0xff] }
 0x1b2   :  { %v3583_v13 = vpop.eup %2294  ;;  %2320 = vtanh.f32 %v473_v57  ;;  %v478_v14 = vsub.f32 %v4450_v61, %v4440_v30  ;;  %v4454_v61 = vld [vmem:[#allocation36_spill] sm:$0xff] }
 0x1b3   :  { %v3587_v36 = vpop.permute.xlu1 %1205  ;;  %v3589_v11 = vpop.eup %2296  ;;  %2322 = vtanh.f32 %v938_v27 }
 0x1b4   :  { %4443 = vst [vmem:[#allocation29_spill] sm:$0xff] %v3587_v36  ;;  %v3593_v51 = vpop.permute.xlu0 %1201  ;;  %v3595_v49 = vpop.eup %2298  ;;  %v939_v36 = vsub.f32 %v4447_v42, %v2901_v43  ;;  %2324 = vtanh.f32 %v937_v15  ;;  %v587_v42 = vadd.f32 %v3500_v29, %v586_v21  ;;  %v480_v29 = vsub.f32 %v4454_v61, %v4440_v30  ;;  %v4459_v61 = vld [vmem:[#allocation38_spill] sm:$0xff] }
 0x1b5   :  { %4445 = vst [vmem:[#allocation16_spill] sm:$0xff] %v3593_v51  ;;  %1695 = vbcast.lane.b32.xlu1 %v3191_v19, 360  ;;  %v3601_v8 = vpop.eup %2300  ;;  %1691 = vbcast.lane.b32.xlu0 %v3191_v19, 352  ;;  %v4448_v51 = vld [vmem:[#allocation33_spill] sm:$0xff]  ;;  %2326 = vtanh.f32 %v476_v18  ;;  %v914_v58 = vsub.f32 %v4459_v61, %v2875_v31 }
 0x1b6   :  { %v3606_v5 = vpop.eup %2302  ;;  %v475_v22 = vsub.f32 %v4448_v51, %v4440_v30  ;;  %v4453_v51 = vld [vmem:[#allocation65_spill] sm:$0xff]  ;;  %2328 = vtanh.f32 %v939_v36 }
 0x1b7   :  { %v3610_v16 = vpop.permute.xlu1 %1213  ;;  %v3612_v23 = vpop.eup %2304 }
 0x1b8   :  { %4449 = vst [vmem:[#allocation30_spill] sm:$0xff] %v3610_v16  ;;  %v3616_v57 = vpop.permute.xlu0 %1209  ;;  %v3618_v17 = vpop.eup %2306  ;;  %v940_v16 = vsub.f32 %v4453_v51, %v2901_v43  ;;  %2330 = vtanh.f32 %v475_v22  ;;  %v588_v22 = vadd.f32 %v3494_v28, %v587_v42 }
 0x1b9   :  { %4451 = vst [vmem:[#allocation31_spill] sm:$0xff] %v3616_v57  ;;  %1703 = vbcast.lane.b32.xlu1 %v3191_v19, 376  ;;  %v3624_v27 = vpop.eup %2308  ;;  %1699 = vbcast.lane.b32.xlu0 %v3191_v19, 368  ;;  %2332 = vtanh.f32 %v478_v14  ;;  %v4456_v57 = vld [vmem:[#allocation37_spill] sm:$0xff]  ;;  %v941_v14 = vsub.f32 %v4461_v35, %v2901_v43  ;;  %v4466_v35 = vld [vmem:[#allocation67_spill] sm:$0xff] }
 0x1ba   :  { %v3629_v15 = vpop.eup %2310  ;;  %v479_v51 = vsub.f32 %v4456_v57, %v4440_v30  ;;  %2334 = vtanh.f32 %v477_v1  ;;  %v946_v1 = vsub.f32 %v3288_v20, %v2891_v39  ;;  %v589_v61 = vadd.f32 %v3511_v34, %v588_v22 }
 0x1bb   :  { %v3633_v18 = vpop.permute.xlu1 %1221  ;;  %v3635_v21 = vpop.eup %2312  ;;  %2336 = vtanh.f32 %v940_v16 }
 0x1bc   :  { %4455 = vst [vmem:[#allocation64_spill] sm:$0xff] %v3633_v18  ;;  %v3641_v36 = vpop.permute.xlu0 %1217  ;;  %v3643_v19 = vpop.eup %2314  ;;  %v4460_v18 = vld [vmem:[#allocation52_spill] sm:$0xff]  ;;  %2338 = vtanh.f32 %v480_v29  ;;  %v942_v29 = vsub.f32 %v4466_v35, %v2901_v43 }
 0x1bd   :  { %4457 = vst [vmem:[#allocation32_spill] sm:$0xff] %v3641_v36  ;;  %4458 = vst [vmem:[#allocation66_spill] sm:$0xff] %v3643_v19  ;;  %1711 = vbcast.lane.b32.xlu1 %v4460_v18, 328  ;;  %v3649_v60 = vpop.eup %2316  ;;  %1707 = vbcast.lane.b32.xlu0 %v4460_v18, 320  ;;  %2340 = vtanh.f32 %v479_v51  ;;  %v4467_v36 = vld [vmem:[#allocation61_spill] sm:$0xff]  ;;  %v4468_v51 = vld [vmem:[#allocation72_spill] sm:$0xff] }
 0x1be   :  { %v3655_v57 = vpop.eup %2318  ;;  %2342 = vtanh.f32 %v914_v58  ;;  %v4472_v35 = vld [vmem:[#allocation40_spill] sm:$0xff] }
 0x1bf   :  { %4462 = vst [vmem:[#allocation33_spill] sm:$0xff] %v3655_v57  ;;  %v3659_v28 = vpop.permute.xlu1 %1232  ;;  %v3661_v42 = vpop.eup %2320  ;;  %2344 = vtanh.f32 %v941_v14  ;;  %v916_v57 = vsub.f32 %v4472_v35, %v2875_v31  ;;  %v590_v14 = vadd.f32 %v3506_v37, %v589_v61  ;;  %v4476_v35 = vld [vmem:[#allocation71_spill] sm:$0xff]  ;;  %v4477_v37 = vld [vmem:[#allocation41_spill] sm:$0xff] }
 0x1c0   :  { %4463 = vst [vmem:[#allocation34_spill] sm:$0xff] %v3659_v28  ;;  %4464 = vst [vmem:[#allocation35_spill] sm:$0xff] %v3661_v42  ;;  %v3665_v16 = vpop.permute.xlu0 %1228  ;;  %v2323_v4 = vpop.eup %2322  ;;  %v599_v28 = vadd.f32 %v3528_v0, %v598_v2  ;;  %v947_v42 = vsub.f32 %v4468_v51, %v2891_v39  ;;  %2346 = vtanh.f32 %v946_v1 }
 0x1c1   :  { %4465 = vst [vmem:[#allocation65_spill] sm:$0xff] %v3665_v16  ;;  %1743 = vbcast.lane.b32.xlu1 %v4467_v36, 328  ;;  %v2325_v20 = vpop.eup %2324  ;;  %1739 = vbcast.lane.b32.xlu0 %v4467_v36, 320  ;;  %v4470_v16 = vld [vmem:[#allocation39_spill] sm:$0xff]  ;;  %2348 = vtanh.f32 %v945_v48  ;;  %v948_v48 = vsub.f32 %v4476_v35, %v2891_v39 }
 0x1c2   :  { %v3675_v47 = vpop.eup %2326  ;;  %v913_v34 = vsub.f32 %v4470_v16, %v2875_v31  ;;  %v1080_v51 = vadd.f32 %v2325_v20, %v2323_v4  ;;  %2350 = vtanh.f32 %v942_v29  ;;  %v600_v16 = vadd.f32 %v3544_v62, %v599_v28 }
 0x1c3   :  { %4469 = vst [vmem:[#allocation36_spill] sm:$0xff] %v3675_v47  ;;  %v3679_v58 = vpop.permute.xlu1 %1240  ;;  %v2329_v22 = vpop.eup %2328  ;;  %v4474_v47 = vld [vmem:[#allocation70_spill] sm:$0xff]  ;;  %2352 = vtanh.f32 %v947_v42  ;;  %v915_v4 = vsub.f32 %v4477_v37, %v2875_v31  ;;  %v591_v42 = vrot.slane %v590_v14, 4 }
 0x1c4   :  { %4471 = vst [vmem:[#allocation37_spill] sm:$0xff] %v3679_v58  ;;  %v3683_v0 = vpop.permute.xlu0 %1236  ;;  %v3685_v2 = vpop.eup %2330  ;;  %v943_v19 = vsub.f32 %v4474_v47, %v2901_v43  ;;  %2354 = vtanh.f32 %v913_v34  ;;  %v1081_v61 = vadd.f32 %v2329_v22, %v1080_v51  ;;  %v4479_v47 = vld [vmem:[#allocation42_spill] sm:$0xff]  ;;  %v601_v22 = vadd.f32 %v3538_v50, %v600_v16 }
 0x1c5   :  { %4473 = vst [vmem:[#allocation38_spill] sm:$0xff] %v3683_v0  ;;  %1771 = vbcast.lane.b32.xlu1 %v3278_v6, 320  ;;  %v3691_v1 = vpop.eup %2332  ;;  %1715 = vbcast.lane.b32.xlu0 %v4460_v18, 336  ;;  %2356 = vtanh.f32 %v916_v57  ;;  %v918_v62 = vsub.f32 %v4479_v47, %v2875_v31  ;;  %v4482_v0 = vld [vmem:[#allocation69_spill] sm:$0xff]  ;;  %v610_v57 = vadd.f32 %v3567_v10, %v3560_v52  ;;  %v4484_v51 = vld [vmem:[#allocation74_spill] sm:$0xff]  ;;  %v4488_v52 = vld [vmem:[#allocation75_spill] sm:$0xff] }
 0x1c6   :  { %4475 = vst [vmem:[#allocation52_spill] sm:$0xff] %v3691_v1  ;;  %v3697_v58 = vpop.eup %2334  ;;  %v944_v1 = vsub.f32 %v4482_v0, %v2901_v43  ;;  %2358 = vtanh.f32 %v943_v19  ;;  %v949_v37 = vsub.f32 %v4484_v51, %v2891_v39  ;;  %v4486_v19 = vld [vmem:[#allocation73_spill] sm:$0xff]  ;;  %v952_v10 = vsub.f32 %v4488_v52, %v2891_v39  ;;  %v4490_v51 = vld [vmem:[#allocation76_spill] sm:$0xff] }
 0x1c7   :  { %v3701_v29 = vpop.permute.xlu1 %1248  ;;  %v2337_v20 = vpop.eup %2336  ;;  %2360 = vtanh.f32 %v948_v48  ;;  %v611_v50 = vadd.f32 %v3578_v38, %v610_v57 }
 0x1c8   :  { %4478 = vst [vmem:[#allocation68_spill] sm:$0xff] %v3701_v29  ;;  %v3705_v28 = vpop.permute.xlu0 %1244  ;;  %v3707_v35 = vpop.eup %2338  ;;  %2362 = vtanh.f32 %v915_v4  ;;  %v1082_v0 = vadd.f32 %v2337_v20, %v1081_v61  ;;  %v950_v29 = vsub.f32 %v4486_v19, %v2891_v39  ;;  %v951_v4 = vsub.f32 %v4490_v51, %v2891_v39  ;;  %v4491_v61 = vld [vmem:[#allocation12_spill] sm:$0xff] }
 0x1c9   :  { %4480 = vst [vmem:[#allocation67_spill] sm:$0xff] %v3705_v28  ;;  %4481 = vst [vmem:[#allocation61_spill] sm:$0xff] %v3707_v35  ;;  %1747 = vbcast.lane.b32.xlu1 %v4467_v36, 336  ;;  %v3712_v34 = vpop.eup %2340  ;;  %1775 = vbcast.lane.b32.xlu0 %v3278_v6, 328  ;;  %2364 = vtanh.f32 %v918_v62  ;;  %v592_v19 = vadd.f32 %v591_v42, %v590_v14  ;;  %v4493_v42 = vld [vmem:[#allocation78_spill] sm:$0xff] }
 0x1ca   :  { %4483 = vst [vmem:[#allocation72_spill] sm:$0xff] %v3712_v34  ;;  %v3720_v47 = vpop.eup %2342  ;;  %2366 = vtanh.f32 %v944_v1  ;;  %v4492_v1 = vld [vmem:[#allocation77_spill] sm:$0xff] }
 0x1cb   :  { %4485 = vst [vmem:[#allocation39_spill] sm:$0xff] %v3720_v47  ;;  %v3724_v28 = vpop.permute.xlu1 %1256  ;;  %v2345_v35 = vpop.eup %2344  ;;  %2368 = vtanh.f32 %v949_v37  ;;  %v954_v51 = vsub.f32 %v4492_v1, %v2904_v44 }
 0x1cc   :  { %4487 = vst [vmem:[#allocation40_spill] sm:$0xff] %v3724_v28  ;;  %v3729_v16 = vpop.permute.xlu0 %1252  ;;  %v2347_v48 = vpop.eup %2346  ;;  %v602_v28 = vadd.f32 %v3555_v46, %v601_v22  ;;  %v1083_v62 = vadd.f32 %v2345_v35, %v1082_v0  ;;  %2370 = vtanh.f32 %v950_v29  ;;  %v953_v22 = vsub.f32 %v4493_v42, %v2904_v44 }
 0x1cd   :  { %4489 = vst [vmem:[#allocation70_spill] sm:$0xff] %v3729_v16  ;;  %1807 = vbcast.lane.b32.xlu1 %v4491_v61, 328  ;;  %v2349_v20 = vpop.eup %2348  ;;  %1803 = vbcast.lane.b32.xlu0 %v4491_v61, 320  ;;  %v612_v16 = vadd.f32 %v3573_v12, %v611_v50  ;;  %2372 = vtanh.f32 %v952_v10  ;;  %v593_v12 = vrot.slane %v592_v19, 2 }
 0x1ce   :  { %v2351_v38 = vpop.eup %2350  ;;  %v1093_v46 = vadd.f32 %v2349_v20, %v2347_v48  ;;  %2374 = vtanh.f32 %v951_v4  ;;  %v603_v37 = vadd.f32 %v3550_v59, %v602_v28  ;;  %v545_v20 = vadd.f32 %v3405_v56, %v3394_v53 }
 0x1cf   :  { %v1268_v57 = vpop.permute.xlu1 %1267  ;;  %v2353_v52 = vpop.eup %2352  ;;  %v1084_v50 = vadd.f32 %v2351_v38, %v1083_v62  ;;  %v613_v28 = vadd.f32 %v3589_v11, %v612_v16  ;;  %v594_v56 = vadd.f32 %v593_v12, %v592_v19 }
 0x1d0   :  { %v1458_v34 = vsub.f32 %v1268_v57, %v2901_v43  ;;  %v1264_v47 = vpop.permute.xlu0 %1263  ;;  %v3740_v14 = vpop.eup %2354  ;;  %v1094_v10 = vadd.f32 %v2353_v52, %v1093_v46  ;;  %v604_v52 = vrot.slane %v603_v37, 4 }
 0x1d1   :  { %v1457_v29 = vsub.f32 %v1264_v47, %v2901_v43  ;;  %1779 = vbcast.lane.b32.xlu1 %v3278_v6, 336  ;;  %v3746_v35 = vpop.eup %2356  ;;  %1719 = vbcast.lane.b32.xlu0 %v4460_v18, 344  ;;  %v4494_v47 = vld [vmem:[#allocation79_spill] sm:$0xff]  ;;  %v614_v12 = vadd.f32 %v3583_v13, %v613_v28 }
 0x1d2   :  { %2376 = vtanh.f32 %v1458_v34  ;;  %v2359_v0 = vpop.eup %2358  ;;  %v956_v57 = vsub.f32 %v4494_v47, %v2904_v44  ;;  %v4495_v34 = vld [vmem:[#allocation80_spill] sm:$0xff] }
 0x1d3   :  { %2378 = vtanh.f32 %v1457_v29  ;;  %v1276_v48 = vpop.permute.xlu1 %1275  ;;  %v2361_v4 = vpop.eup %2360  ;;  %v955_v38 = vsub.f32 %v4495_v34, %v2904_v44  ;;  %v1085_v46 = vadd.f32 %v2359_v0, %v1084_v50 }
 0x1d4   :  { %2380 = vtanh.f32 %v954_v51  ;;  %v1460_v1 = vsub.f32 %v1276_v48, %v2901_v43  ;;  %v1272_v42 = vpop.permute.xlu0 %1271  ;;  %v3755_v59 = vpop.eup %2362  ;;  %v1095_v29 = vadd.f32 %v2361_v4, %v1094_v10  ;;  %v4497_v48 = vld [vmem:[#allocation81_spill] sm:$0xff]  ;;  %v605_v4 = vadd.f32 %v604_v52, %v603_v37 }
 0x1d5   :  { %2382 = vtanh.f32 %v953_v22  ;;  %v1459_v62 = vsub.f32 %v1272_v42, %v2901_v43  ;;  %1839 = vbcast.lane.b32.xlu1 %v2881_v33, 328  ;;  %v3762_v53 = vpop.eup %2364  ;;  %1835 = vbcast.lane.b32.xlu0 %v2881_v33, 320  ;;  %v546_v22 = vadd.f32 %v3388_v63, %v545_v20  ;;  %v958_v47 = vsub.f32 %v4497_v48, %v2904_v44 }
 0x1d6   :  { %4496 = vst [vmem:[#allocation71_spill] sm:$0xff] %v3762_v53  ;;  %2384 = vtanh.f32 %v1460_v1  ;;  %v2367_v51 = vpop.eup %2366  ;;  %v4498_v1 = vld [vmem:[#allocation82_spill] sm:$0xff]  ;;  %v595_v63 = vrot.slane %v594_v56, 1  ;;  %v615_v52 = vadd.f32 %v3601_v8, %v614_v12  ;;  %v623_v8 = vadd.f32 %v3612_v23, %v3606_v5 }
 0x1d7   :  { %2386 = vtanh.f32 %v1459_v62  ;;  %v1284_v11 = vpop.permute.xlu1 %1283  ;;  %v2369_v16 = vpop.eup %2368  ;;  %v957_v0 = vsub.f32 %v4498_v1, %v2904_v44  ;;  %v961_v5 = vsub.f32 %v3338_v24, %v2907_v45  ;;  %v4504_v24 = vld [vmem:[#allocation86_spill] sm:$0xff] }
 0x1d8   :  { %2388 = vtanh.f32 %v956_v57  ;;  %v1462_v42 = vsub.f32 %v1284_v11, %v2901_v43  ;;  %v1280_v34 = vpop.permute.xlu0 %1279  ;;  %v2371_v19 = vpop.eup %2370  ;;  %v1086_v57 = vadd.f32 %v2367_v51, %v1085_v46  ;;  %v1096_v62 = vadd.f32 %v2369_v16, %v1095_v29  ;;  %v4499_v11 = vld [vmem:[#allocation83_spill] sm:$0xff]  ;;  %v4500_v51 = vld [vmem:[#allocation84_spill] sm:$0xff]  ;;  %v4501_v16 = vld [vmem:[#allocation14_spill] sm:$0xff] }
 0x1d9   :  { %2390 = vtanh.f32 %v955_v38  ;;  %v1461_v50 = vsub.f32 %v1280_v34, %v2901_v43  ;;  %1811 = vbcast.lane.b32.xlu1 %v4491_v61, 336  ;;  %v3774_v10 = vpop.eup %2372  ;;  %1751 = vbcast.lane.b32.xlu0 %v4467_v36, 344  ;;  %v3778_v38 = vadd.f32 %v3400_v55, %v546_v22  ;;  %v960_v48 = vsub.f32 %v4499_v11, %v2904_v44  ;;  %v4502_v22 = vld [vmem:[#allocation17_spill] sm:$0xff] }
 0x1da   :  { %2392 = vtanh.f32 %v1462_v42  ;;  %v2375_v20 = vpop.eup %2374  ;;  %v959_v46 = vsub.f32 %v4500_v51, %v2904_v44  ;;  %v3790_v42 = vadd.f32 %v595_v63, %v594_v56  ;;  %v1087_v12 = vrot.slane %v1086_v57, 4  ;;  %v4503_v51 = vld [vmem:[#allocation85_spill] sm:$0xff] }
 0x1db   :  { %2394 = vtanh.f32 %v1461_v50  ;;  %v1292_v13 = vpop.permute.xlu1 %1291  ;;  %v606_v50 = vrot.slane %v605_v4, 2  ;;  %v616_v53 = vadd.f32 %v3595_v49, %v615_v52 }
 0x1dc   :  { %v2377_v28 = vpop.eup %2376  ;;  %2396 = vtanh.f32 %v958_v47  ;;  %v1464_v34 = vsub.f32 %v1292_v13, %v2901_v43  ;;  %v1288_v1 = vpop.permute.xlu0 %1287 }
 0x1dd   :  { %v2379_v37 = vpop.eup %2378  ;;  %2398 = vtanh.f32 %v957_v0  ;;  %v1463_v29 = vsub.f32 %v1288_v1, %v2901_v43  ;;  %1871 = vbcast.lane.b32.xlu1 %v2894_v40, 328  ;;  %1867 = vbcast.lane.b32.xlu0 %v2894_v40, 320  ;;  %v1097_v0 = vadd.f32 %v2371_v19, %v1096_v62  ;;  %v962_v43 = vsub.f32 %v4503_v51, %v2907_v45 }
 0x1de   :  { %v2381_v55 = vpop.eup %2380  ;;  %2400 = vtanh.f32 %v1464_v34  ;;  %v1600_v47 = vadd.f32 %v2379_v37, %v2377_v28  ;;  %v607_v62 = vadd.f32 %v606_v50, %v605_v4  ;;  %v1088_v37 = vadd.f32 %v1087_v12, %v1086_v57 }
 0x1df   :  { %v2383_v13 = vpop.eup %2382  ;;  %2402 = vtanh.f32 %v1463_v29  ;;  %v1303_v11 = vpop.permute.xlu1 %1302  ;;  %v964_v51 = vsub.f32 %v4504_v24, %v2907_v45 }
 0x1e0   :  { %v2385_v1 = vpop.eup %2384  ;;  %2404 = vtanh.f32 %v960_v48  ;;  %v1466_v56 = vsub.f32 %v1303_v11, %v2891_v39  ;;  %v1299_v63 = vpop.permute.xlu0 %1298  ;;  %v624_v48 = vadd.f32 %v3624_v27, %v623_v8  ;;  %v1098_v11 = vadd.f32 %v2375_v20, %v1097_v0 }
 0x1e1   :  { %v2387_v34 = vpop.eup %2386  ;;  %2406 = vtanh.f32 %v959_v46  ;;  %v1465_v23 = vsub.f32 %v1299_v63, %v2891_v39  ;;  %1783 = vbcast.lane.b32.xlu1 %v3278_v6, 344  ;;  %1723 = vbcast.lane.b32.xlu0 %v4460_v18, 352  ;;  %v1106_v49 = vadd.f32 %v2383_v13, %v2381_v55  ;;  %v963_v8 = vsub.f32 %v3352_v32, %v2907_v45 }
 0x1e2   :  { %v2389_v19 = vpop.eup %2388  ;;  %v1601_v29 = vadd.f32 %v2387_v34, %v1600_v47  ;;  %2408 = vtanh.f32 %v1466_v56  ;;  %v617_v47 = vrot.slane %v616_v53, 4  ;;  %v625_v0 = vadd.f32 %v3618_v17, %v624_v48 }
 0x1e3   :  { %v2391_v28 = vpop.eup %2390  ;;  %2410 = vtanh.f32 %v1465_v23  ;;  %v1311_v52 = vpop.permute.xlu1 %1310  ;;  %v1099_v56 = vadd.f32 %v3774_v10, %v1098_v11  ;;  %v965_v17 = vsub.f32 %v3366_v7, %v2907_v45 }
 0x1e4   :  { %v2393_v46 = vpop.eup %2392  ;;  %2412 = vtanh.f32 %v962_v43  ;;  %v1602_v63 = vadd.f32 %v2385_v1, %v1601_v29  ;;  %v1468_v4 = vsub.f32 %v1311_v52, %v2891_v39  ;;  %v1307_v50 = vpop.permute.xlu0 %1306  ;;  %v608_v43 = vrot.slane %v607_v62, 1 }
 0x1e5   :  { %v2395_v27 = vpop.eup %2394  ;;  %2414 = vtanh.f32 %v961_v5  ;;  %v1467_v20 = vsub.f32 %v1307_v50, %v2891_v39  ;;  %1899 = vbcast.lane.b32.xlu1 %v2897_v41, 320  ;;  %v1107_v55 = vadd.f32 %v2391_v28, %v1106_v49  ;;  %1843 = vbcast.lane.b32.xlu0 %v2881_v33, 336  ;;  %v1089_v1 = vrot.slane %v1088_v37, 2 }
 0x1e6   :  { %v3812_v57 = vpop.eup %2396  ;;  %v1603_v13 = vadd.f32 %v2395_v27, %v1602_v63  ;;  %2416 = vtanh.f32 %v1468_v4  ;;  %v966_v5 = vsub.f32 %v3362_v25, %v2907_v45  ;;  %v618_v52 = vadd.f32 %v617_v47, %v616_v53 }
 0x1e7   :  { %v2399_v12 = vpop.eup %2398  ;;  %2418 = vtanh.f32 %v1467_v20  ;;  %v1319_v32 = vpop.permute.xlu1 %1318  ;;  %v3826_v11 = vadd.f32 %v608_v43, %v607_v62  ;;  %v1108_v24 = vadd.f32 %v2389_v19, %v1107_v55  ;;  %v626_v53 = vadd.f32 %v3635_v21, %v625_v0 }
 0x1e8   :  { %v2401_v34 = vpop.eup %2400  ;;  %2420 = vtanh.f32 %v964_v51  ;;  %v1604_v23 = vadd.f32 %v2393_v46, %v1603_v13  ;;  %v1470_v29 = vsub.f32 %v1319_v32, %v2891_v39  ;;  %v1315_v28 = vpop.permute.xlu0 %1314  ;;  %v1090_v51 = vadd.f32 %v1089_v1, %v1088_v37 }
 0x1e9   :  { %v2403_v49 = vpop.eup %2402  ;;  %2422 = vtanh.f32 %v963_v8  ;;  %v1469_v48 = vsub.f32 %v1315_v28, %v2891_v39  ;;  %1755 = vbcast.lane.b32.xlu1 %v4467_v36, 352  ;;  %1903 = vbcast.lane.b32.xlu0 %v2897_v41, 328  ;;  %v1100_v63 = vrot.slane %v1099_v56, 4  ;;  %v968_v50 = vsub.f32 %v3376_v9, %v2907_v45 }
 0x1ea   :  { %v3824_v10 = vpop.eup %2404  ;;  %v1605_v25 = vadd.f32 %v2403_v49, %v1604_v23  ;;  %2424 = vtanh.f32 %v1470_v29  ;;  %v619_v8 = vrot.slane %v618_v52, 2  ;;  %v967_v20 = vsub.f32 %v3380_v26, %v2907_v45 }
 0x1eb   :  { %v3829_v46 = vpop.eup %2406  ;;  %2426 = vtanh.f32 %v1469_v48  ;;  %v1327_v7 = vpop.permute.xlu1 %1326  ;;  %v1109_v43 = vadd.f32 %v2399_v12, %v1108_v24  ;;  %v627_v0 = vadd.f32 %v3629_v15, %v626_v53  ;;  %v1091_v1 = vrot.slane %v1090_v51, 1 }
 0x1ec   :  { %v2409_v4 = vpop.eup %2408  ;;  %2428 = vtanh.f32 %v966_v5  ;;  %v1606_v62 = vadd.f32 %v2401_v34, %v1605_v25  ;;  %v1472_v19 = vsub.f32 %v1327_v7, %v2891_v39  ;;  %v1323_v27 = vpop.permute.xlu0 %1322  ;;  %v1101_v32 = vadd.f32 %v1100_v63, %v1099_v56 }
 0x1ed   :  { %v2411_v47 = vpop.eup %2410  ;;  %2430 = vtanh.f32 %v965_v17  ;;  %v1471_v21 = vsub.f32 %v1323_v27, %v2891_v39  ;;  %1875 = vbcast.lane.b32.xlu1 %v2894_v40, 336  ;;  %1815 = vbcast.lane.b32.xlu0 %v4491_v61, 344  ;;  %v970_v26 = vsub.f32 %v3392_v3, %v4440_v30  ;;  %v3844_v49 = vadd.f32 %v619_v8, %v618_v52 }
 0x1ee   :  { %v2413_v37 = vpop.eup %2412  ;;  %v1607_v55 = vrot.slane %v1606_v62, 4  ;;  %v1613_v13 = vadd.f32 %v2411_v47, %v2409_v4  ;;  %2432 = vtanh.f32 %v1472_v19  ;;  %v969_v15 = vsub.f32 %v3398_v54, %v4440_v30  ;;  %v4505_v47 = vld [vmem:[#allocation90_spill] sm:$0xff] }
 0x1ef   :  { %v2415_v9 = vpop.eup %2414  ;;  %2434 = vtanh.f32 %v1471_v21  ;;  %v1338_v34 = vpop.permute.xlu1 %1337  ;;  %v1110_v48 = vadd.f32 %v3812_v57, %v1109_v43  ;;  %v628_v52 = vadd.f32 %v3649_v60, %v627_v0  ;;  %v1092_v53 = vadd.f32 %v1091_v1, %v1090_v51 }
 0x1f0   :  { %v2417_v5 = vpop.eup %2416  ;;  %2436 = vtanh.f32 %v968_v50  ;;  %v1608_v23 = vadd.f32 %v1607_v55, %v1606_v62  ;;  %v1474_v12 = vsub.f32 %v1338_v34, %v2904_v44  ;;  %v1334_v29 = vpop.permute.xlu0 %1333  ;;  %v1102_v63 = vrot.slane %v1101_v32, 2  ;;  %v4506_v34 = vld [vmem:[#allocation88_spill] sm:$0xff] }
 0x1f1   :  { %v2419_v28 = vpop.eup %2418  ;;  %2438 = vtanh.f32 %v967_v20  ;;  %v1473_v56 = vsub.f32 %v1334_v29, %v2904_v44  ;;  %1787 = vbcast.lane.b32.xlu1 %v3278_v6, 352  ;;  %1727 = vbcast.lane.b32.xlu0 %v4460_v18, 360  ;;  %v1119_v27 = vadd.f32 %v2415_v9, %v2413_v37  ;;  %v971_v8 = vsub.f32 %v4505_v47, %v4440_v30 }
 0x1f2   :  { %v2421_v17 = vpop.eup %2420  ;;  %v1609_v24 = vrot.slane %v1608_v23, 2  ;;  %v1614_v3 = vadd.f32 %v2419_v28, %v1613_v13  ;;  %2440 = vtanh.f32 %v1474_v12  ;;  %v1111_v51 = vadd.f32 %v3829_v46, %v1110_v48 }
 0x1f3   :  { %v2423_v25 = vpop.eup %2422  ;;  %2442 = vtanh.f32 %v1473_v56  ;;  %v1346_v7 = vpop.permute.xlu1 %1345  ;;  %v1103_v13 = vadd.f32 %v1102_v63, %v1101_v32  ;;  %v1148_v0 = vadd.f32 %v1092_v53, %v3790_v42  ;;  %v621_v28 = vrot.slane %v3844_v49, 1  ;;  %v4507_v32 = vld [vmem:[#allocation94_spill] sm:$0xff] }
 0x1f4   :  { %v2425_v54 = vpop.eup %2424  ;;  %2444 = vtanh.f32 %v970_v26  ;;  %v1610_v4 = vadd.f32 %v1609_v24, %v1608_v23  ;;  %v1615_v50 = vadd.f32 %v2417_v5, %v1614_v3  ;;  %v1476_v62 = vsub.f32 %v1346_v7, %v2904_v44  ;;  %v1342_v19 = vpop.permute.xlu0 %1341  ;;  %v4508_v53 = vld [vmem:[#allocation66_spill] sm:$0xff] }
 0x1f5   :  { %v2427_v57 = vpop.eup %2426  ;;  %2446 = vtanh.f32 %v969_v15  ;;  %v1475_v20 = vsub.f32 %v1342_v19, %v2904_v44  ;;  %1907 = vbcast.lane.b32.xlu1 %v2897_v41, 336  ;;  %1847 = vbcast.lane.b32.xlu0 %v2881_v33, 344  ;;  %v1120_v37 = vadd.f32 %v2423_v25, %v1119_v27  ;;  %v972_v5 = vsub.f32 %v4506_v34, %v4440_v30 }
 0x1f6   :  { %v3858_v60 = vpop.eup %2428  ;;  %v1611_v21 = vrot.slane %v1610_v4, 1  ;;  %v1616_v43 = vadd.f32 %v2427_v57, %v1615_v50  ;;  %2448 = vtanh.f32 %v1476_v62  ;;  %v974_v15 = vsub.f32 %v4507_v32, %v4440_v30  ;;  %v4509_v62 = vld [vmem:[#allocation96_spill] sm:$0xff] }
 0x1f7   :  { %v2431_v55 = vpop.eup %2430  ;;  %2450 = vtanh.f32 %v1475_v20  ;;  %v1354_v9 = vpop.permute.xlu1 %1353  ;;  %v1112_v48 = vadd.f32 %v3824_v10, %v1111_v51  ;;  %v3880_v63 = vadd.f32 %v4508_v53, %v628_v52  ;;  %v1104_v7 = vrot.slane %v1103_v13, 1  ;;  %v4511_v20 = vld [vmem:[#allocation35_spill] sm:$0xff]  ;;  %v4512_v52 = vld [vmem:[#allocation102_spill] sm:$0xff]  ;;  %v4513_v53 = vld [vmem:[#allocation105_spill] sm:$0xff] }
 0x1f8   :  { %v2433_v1 = vpop.eup %2432  ;;  %v1612_v26 = vadd.f32 %v1611_v21, %v1610_v4  ;;  %v1617_v23 = vadd.f32 %v2425_v54, %v1616_v43  ;;  %v1478_v46 = vsub.f32 %v1354_v9, %v2904_v44  ;;  %v1350_v12 = vpop.permute.xlu0 %1349  ;;  %2452 = vtanh.f32 %v971_v8  ;;  %v4510_v8 = vld [vmem:[#allocation33_spill] sm:$0xff] }
 0x1f9   :  { %v2435_v29 = vpop.eup %2434  ;;  %v1477_v56 = vsub.f32 %v1350_v12, %v2904_v44  ;;  %1819 = vbcast.lane.b32.xlu1 %v4491_v61, 352  ;;  %1759 = vbcast.lane.b32.xlu0 %v4467_v36, 360  ;;  %v1121_v54 = vadd.f32 %v2421_v17, %v1120_v37  ;;  %v973_v10 = vsub.f32 %v4509_v62, %v4440_v30  ;;  %v1113_v37 = vrot.slane %v1112_v48, 4 }
 0x1fa   :  { %v3871_v42 = vpop.eup %2436  ;;  %v1618_v24 = vadd.f32 %v2435_v29, %v1617_v23  ;;  %2454 = vtanh.f32 %v1478_v46  ;;  %v3875_v3 = vadd.f32 %v1612_v26, %v1148_v0  ;;  %v636_v51 = vadd.f32 %v4511_v20, %v4510_v8 }
 0x1fb   :  { %v3877_v25 = vpop.eup %2438  ;;  %2456 = vtanh.f32 %v1477_v56  ;;  %v1362_v4 = vpop.permute.xlu1 %1361  ;;  %v975_v21 = vsub.f32 %v4512_v52, %v4440_v30  ;;  %v1122_v26 = vadd.f32 %v2431_v55, %v1121_v54 }
 0x1fc   :  { %v2441_v50 = vpop.eup %2440  ;;  %2458 = vtanh.f32 %v972_v5  ;;  %v1619_v19 = vadd.f32 %v2433_v1, %v1618_v24  ;;  %v1480_v57 = vsub.f32 %v1362_v4, %v2904_v44  ;;  %v1358_v27 = vpop.permute.xlu0 %1357  ;;  %v637_v34 = vadd.f32 %v3685_v2, %v636_v51 }
 0x1fd   :  { %v2443_v47 = vpop.eup %2442  ;;  %2460 = vtanh.f32 %v974_v15  ;;  %v1479_v17 = vsub.f32 %v1358_v27, %v2904_v44  ;;  %1731 = vbcast.lane.b32.xlu1 %v4460_v18, 368  ;;  %1879 = vbcast.lane.b32.xlu0 %v2894_v40, 344  ;;  %v1105_v5 = vadd.f32 %v1104_v7, %v1103_v13  ;;  %v3895_v15 = vadd.f32 %v621_v28, %v3844_v49  ;;  %v4514_v49 = vld [vmem:[#allocation36_spill] sm:$0xff] }
 0x1fe   :  { %v2445_v43 = vpop.eup %2444  ;;  %v1620_v9 = vrot.slane %v1619_v19, 4  ;;  %v1626_v0 = vadd.f32 %v2443_v47, %v2441_v50  ;;  %2462 = vtanh.f32 %v1480_v57  ;;  %v630_v24 = vrot.slane %v3880_v63, 4  ;;  %v4515_v57 = vld [vmem:[#allocation106_spill] sm:$0xff] }
 0x1ff   :  { %v2447_v1 = vpop.eup %2446  ;;  %2464 = vtanh.f32 %v1479_v17  ;;  %v1373_v23 = vpop.permute.xlu1 %1372  ;;  %v1434_v2 = vsub.f32 %v4513_v53, %v2875_v31  ;;  %v1114_v13 = vadd.f32 %v1113_v37, %v1112_v48  ;;  %v638_v28 = vadd.f32 %v4514_v49, %v637_v34 }
 0x200   :  { %v2449_v46 = vpop.eup %2448  ;;  %2466 = vtanh.f32 %v973_v10  ;;  %v1621_v12 = vadd.f32 %v1620_v9, %v1619_v19  ;;  %v1482_v29 = vsub.f32 %v1373_v23, %v2907_v45  ;;  %v1369_v32 = vpop.permute.xlu0 %1368  ;;  %v1123_v50 = vadd.f32 %v3858_v60, %v1122_v26 }
 0x201   :  { %v2451_v56 = vpop.eup %2450  ;;  %2468 = vtanh.f32 %v975_v21  ;;  %v1481_v55 = vsub.f32 %v1369_v32, %v2907_v45  ;;  %1851 = vbcast.lane.b32.xlu1 %v2881_v33, 352  ;;  %1791 = vbcast.lane.b32.xlu0 %v3278_v6, 360  ;;  %v1149_v10 = vadd.f32 %v1105_v5, %v3826_v11  ;;  %v1433_v27 = vsub.f32 %v4515_v57, %v2875_v31  ;;  %v4516_v21 = vld [vmem:[#allocation108_spill] sm:$0xff] }
 0x202   :  { %v1622_v7 = vrot.slane %v1621_v12, 2  ;;  %v1627_v54 = vadd.f32 %v2451_v56, %v1626_v0  ;;  %2470 = vtanh.f32 %v1482_v29  ;;  %v2453_v4 = vpop.eup %2452  ;;  %v1132_v52 = vadd.f32 %v2447_v1, %v2445_v43  ;;  %v4517_v1 = vld [vmem:[#allocation100_spill] sm:$0xff] }
 0x203   :  { %2472 = vtanh.f32 %v1481_v55  ;;  %v1381_v62 = vpop.permute.xlu1 %1380  ;;  %v1435_v17 = vsub.f32 %v4516_v21, %v2875_v31  ;;  %v1115_v37 = vrot.slane %v1114_v13, 2  ;;  %v1124_v5 = vadd.f32 %v3877_v25, %v1123_v50  ;;  %v4518_v55 = vld [vmem:[#allocation107_spill] sm:$0xff] }
 0x204   :  { %v2455_v19 = vpop.eup %2454  ;;  %v1623_v47 = vadd.f32 %v1622_v7, %v1621_v12  ;;  %v1628_v48 = vadd.f32 %v2449_v46, %v1627_v54  ;;  %v1484_v8 = vsub.f32 %v1381_v62, %v2907_v45  ;;  %v1377_v20 = vpop.permute.xlu0 %1376  ;;  %2474 = vtanh.f32 %v1434_v2 }
 0x205   :  { %v2457_v51 = vpop.eup %2456  ;;  %v1483_v60 = vsub.f32 %v1377_v20, %v2907_v45  ;;  %1763 = vbcast.lane.b32.xlu1 %v4467_v36, 368  ;;  %1911 = vbcast.lane.b32.xlu0 %v2897_v41, 344  ;;  %v1133_v43 = vadd.f32 %v2453_v4, %v1132_v52  ;;  %v976_v26 = vsub.f32 %v4517_v1, %v4440_v30  ;;  %v4521_v52 = vld [vmem:[#allocation52_spill] sm:$0xff]  ;;  %v4522_v1 = vld [vmem:[#allocation45_spill] sm:$0xff] }
 0x206   :  { %v2459_v11 = vpop.eup %2458  ;;  %v1624_v9 = vrot.slane %v1623_v47, 1  ;;  %v1629_v0 = vadd.f32 %v2457_v51, %v1628_v48  ;;  %2476 = vtanh.f32 %v1484_v8  ;;  %v3921_v2 = vadd.f32 %v630_v24, %v3880_v63 }
 0x207   :  { %v3914_v34 = vpop.eup %2460  ;;  %2478 = vtanh.f32 %v1483_v60  ;;  %v1389_v23 = vpop.permute.xlu1 %1388  ;;  %v1436_v25 = vsub.f32 %v4518_v55, %v2875_v31  ;;  %v639_v4 = vadd.f32 %v3697_v58, %v638_v28  ;;  %v1116_v63 = vadd.f32 %v1115_v37, %v1114_v13  ;;  %v4520_v13 = vld [vmem:[#allocation110_spill] sm:$0xff] }
 0x208   :  { %v2463_v46 = vpop.eup %2462  ;;  %2480 = vtanh.f32 %v1433_v27  ;;  %v1630_v12 = vadd.f32 %v2455_v19, %v1629_v0  ;;  %v1486_v29 = vsub.f32 %v1389_v23, %v2907_v45  ;;  %v1385_v32 = vpop.permute.xlu0 %1384  ;;  %v1625_v56 = vadd.f32 %v1624_v9, %v1623_v47  ;;  %v4519_v47 = vld [vmem:[#allocation43_spill] sm:$0xff] }
 0x209   :  { %v2465_v53 = vpop.eup %2464  ;;  %2482 = vtanh.f32 %v1435_v17  ;;  %v1485_v7 = vsub.f32 %v1385_v32, %v2907_v45  ;;  %1883 = vbcast.lane.b32.xlu1 %v2894_v40, 352  ;;  %1823 = vbcast.lane.b32.xlu0 %v4491_v61, 360  ;;  %v1125_v24 = vadd.f32 %v3871_v42, %v1124_v5  ;;  %v1134_v19 = vadd.f32 %v2459_v11, %v1133_v43  ;;  %v4523_v32 = vld [vmem:[#allocation44_spill] sm:$0xff] }
 0x20a   :  { %v2467_v54 = vpop.eup %2466  ;;  %v1631_v49 = vadd.f32 %v2465_v53, %v1630_v12  ;;  %2484 = vtanh.f32 %v1486_v29  ;;  %v3929_v50 = vadd.f32 %v1625_v56, %v1149_v10  ;;  %v917_v48 = vsub.f32 %v4519_v47, %v2875_v31 }
 0x20b   :  { %v3931_v62 = vpop.eup %2468  ;;  %2486 = vtanh.f32 %v1485_v7  ;;  %v1397_v57 = vpop.permute.xlu1 %1396  ;;  %v632_v10 = vrot.slane %v3921_v2, 2  ;;  %v1437_v51 = vsub.f32 %v4520_v13, %v2875_v31  ;;  %v3943_v21 = vadd.f32 %v4521_v52, %v639_v4  ;;  %v4525_v7 = vld [vmem:[#allocation39_spill] sm:$0xff] }
 0x20c   :  { %v2471_v27 = vpop.eup %2470  ;;  %2488 = vtanh.f32 %v976_v26  ;;  %v1632_v58 = vadd.f32 %v2463_v46, %v1631_v49  ;;  %v1488_v28 = vsub.f32 %v1397_v57, %v2907_v45  ;;  %v1393_v8 = vpop.permute.xlu0 %1392  ;;  %v1117_v37 = vrot.slane %v1116_v63, 1 }
 0x20d   :  { %v2473_v20 = vpop.eup %2472  ;;  %2490 = vtanh.f32 %v1436_v25  ;;  %v1487_v42 = vsub.f32 %v1393_v8, %v2907_v45  ;;  %1795 = vbcast.lane.b32.xlu1 %v3278_v6, 368  ;;  %1735 = vbcast.lane.b32.xlu0 %v4460_v18, 376  ;;  %v1126_v9 = vrot.slane %v1125_v24, 4  ;;  %v1135_v0 = vadd.f32 %v2467_v54, %v1134_v19  ;;  %v4524_v18 = vld [vmem:[#allocation109_spill] sm:$0xff] }
 0x20e   :  { %v1633_v17 = vrot.slane %v1632_v58, 4  ;;  %v1639_v60 = vadd.f32 %v2473_v20, %v2471_v27  ;;  %2492 = vtanh.f32 %v1488_v28  ;;  %v2475_v11 = vpop.eup %2474  ;;  %v919_v26 = vsub.f32 %v4522_v1, %v2875_v31 }
 0x20f   :  { %2494 = vtanh.f32 %v1487_v42  ;;  %v1408_v5 = vpop.permute.xlu1 %1407  ;;  %v920_v56 = vsub.f32 %v4523_v32, %v2875_v31  ;;  %v1438_v53 = vsub.f32 %v4524_v18, %v2875_v31  ;;  %v1041_v54 = vadd.f32 %v3740_v14, %v4525_v7  ;;  %v4526_v42 = vld [vmem:[#allocation26_spill] sm:$0xff]  ;;  %v4528_v18 = vld [vmem:[#allocation25_spill] sm:$0xff] }
 0x210   :  { %v2477_v43 = vpop.eup %2476  ;;  %2496 = vtanh.f32 %v917_v48  ;;  %v1634_v23 = vadd.f32 %v1633_v17, %v1632_v58  ;;  %v1490_v46 = vsub.f32 %v1408_v5, %v4440_v30  ;;  %v1404_v12 = vpop.permute.xlu0 %1403  ;;  %v1127_v57 = vadd.f32 %v1126_v9, %v1125_v24 }
 0x211   :  { %v2479_v29 = vpop.eup %2478  ;;  %2498 = vtanh.f32 %v1437_v51  ;;  %v1489_v55 = vsub.f32 %v1404_v12, %v4440_v30  ;;  %1915 = vbcast.lane.b32.xlu1 %v2897_v41, 352  ;;  %1855 = vbcast.lane.b32.xlu0 %v2881_v33, 360  ;;  %v1136_v27 = vadd.f32 %v3914_v34, %v1135_v0  ;;  %v1118_v48 = vadd.f32 %v1117_v37, %v1116_v63 }
 0x212   :  { %v2481_v25 = vpop.eup %2480  ;;  %v1635_v4 = vrot.slane %v1634_v23, 2  ;;  %v1640_v49 = vadd.f32 %v2479_v29, %v1639_v60  ;;  %2500 = vtanh.f32 %v1490_v46  ;;  %v1042_v51 = vadd.f32 %v3755_v59, %v1041_v54  ;;  %v4527_v29 = vld [vmem:[#allocation72_spill] sm:$0xff] }
 0x213   :  { %v2483_v19 = vpop.eup %2482  ;;  %2502 = vtanh.f32 %v1489_v55  ;;  %v1416_v47 = vpop.permute.xlu1 %1415  ;;  %v1439_v52 = vsub.f32 %v4526_v42, %v2875_v31  ;;  %v1561_v63 = vadd.f32 %v2481_v25, %v2475_v11  ;;  %v1128_v9 = vrot.slane %v1127_v57, 2 }
 0x214   :  { %v2485_v58 = vpop.eup %2484  ;;  %2504 = vtanh.f32 %v919_v26  ;;  %v1636_v28 = vadd.f32 %v1635_v4, %v1634_v23  ;;  %v1641_v8 = vadd.f32 %v2477_v43, %v1640_v49  ;;  %v1492_v20 = vsub.f32 %v1416_v47, %v4440_v30  ;;  %v1412_v13 = vpop.permute.xlu0 %1411 }
 0x215   :  { %v2487_v14 = vpop.eup %2486  ;;  %2506 = vtanh.f32 %v1438_v53  ;;  %v1491_v24 = vsub.f32 %v1412_v13, %v4440_v30  ;;  %1827 = vbcast.lane.b32.xlu1 %v4491_v61, 368  ;;  %1767 = vbcast.lane.b32.xlu0 %v4467_v36, 376  ;;  %v1137_v0 = vadd.f32 %v3931_v62, %v1136_v27  ;;  %v1150_v5 = vadd.f32 %v1118_v48, %v3895_v15 }
 0x216   :  { %v2489_v34 = vpop.eup %2488  ;;  %v1642_v17 = vadd.f32 %v2487_v14, %v1641_v8  ;;  %2508 = vtanh.f32 %v1492_v20  ;;  %v1637_v60 = vrot.slane %v1636_v28, 1  ;;  %v1562_v1 = vadd.f32 %v2483_v19, %v1561_v63  ;;  %v4530_v8 = vld [vmem:[#allocation61_spill] sm:$0xff] }
 0x217   :  { %v2491_v37 = vpop.eup %2490  ;;  %2510 = vtanh.f32 %v1491_v24  ;;  %v1424_v59 = vpop.permute.xlu1 %1423  ;;  %v641_v36 = vadd.f32 %v4527_v29, %v3943_v21  ;;  %v1440_v53 = vsub.f32 %v4528_v18, %v2875_v31  ;;  %v1043_v55 = vadd.f32 %v3746_v35, %v1042_v51  ;;  %v4529_v21 = vld [vmem:[#allocation18_spill] sm:$0xff] }
 0x218   :  { %v2493_v43 = vpop.eup %2492  ;;  %v1643_v26 = vadd.f32 %v2485_v58, %v1642_v17  ;;  %v1494_v23 = vsub.f32 %v1424_v59, %v4440_v30  ;;  %v1420_v46 = vpop.permute.xlu0 %1419  ;;  %v1638_v11 = vadd.f32 %v1637_v60, %v1636_v28  ;;  %2512 = vtanh.f32 %v1439_v52  ;;  %v4531_v52 = vld [vmem:[#allocation89_spill] sm:$0xff] }
 0x219   :  { %v2495_v12 = vpop.eup %2494  ;;  %v1493_v62 = vsub.f32 %v1420_v46, %v4440_v30  ;;  %1799 = vbcast.lane.b32.xlu1 %v3278_v6, 376  ;;  %1887 = vbcast.lane.b32.xlu0 %v2894_v40, 360  ;;  %v433_v4 = vsub.f32 %v4529_v21, %v4501_v16  ;;  %v1138_v49 = vadd.f32 %v2489_v34, %v1137_v0 }
 0x21a   :  { %v2497_v15 = vpop.eup %2496  ;;  %v1644_v25 = vadd.f32 %v2495_v12, %v1643_v26  ;;  %2514 = vtanh.f32 %v1494_v23  ;;  %v3977_v7 = vadd.f32 %v1638_v11, %v1150_v5  ;;  %v1129_v27 = vadd.f32 %v1128_v9, %v1127_v57  ;;  %v4534_v11 = vld [vmem:[#allocation87_spill] sm:$0xff] }
 0x21b   :  { %v2499_v54 = vpop.eup %2498  ;;  %2516 = vtanh.f32 %v1493_v62  ;;  %v1432_v19 = vpop.permute.xlu1 %1431  ;;  %v1563_v6 = vadd.f32 %v2491_v37, %v1562_v1  ;;  %v642_v20 = vadd.f32 %v4530_v8, %v641_v36  ;;  %v633_v57 = vadd.f32 %v632_v10, %v3921_v2  ;;  %v4533_v1 = vld [vmem:[#allocation71_spill] sm:$0xff] }
 0x21c   :  { %v2501_v47 = vpop.eup %2500  ;;  %2518 = vtanh.f32 %v920_v56  ;;  %v1645_v35 = vadd.f32 %v2493_v43, %v1644_v25  ;;  %v1496_v48 = vsub.f32 %v1432_v19, %v4440_v30  ;;  %v1428_v58 = vpop.permute.xlu0 %1427  ;;  %v1044_v32 = vadd.f32 %v2497_v15, %v1043_v55 }
 0x21d   :  { %v2503_v28 = vpop.eup %2502  ;;  %2520 = vtanh.f32 %v1440_v53  ;;  %v1495_v13 = vsub.f32 %v1428_v58, %v4440_v30  ;;  %1919 = vbcast.lane.b32.xlu1 %v2897_v41, 360  ;;  %1859 = vbcast.lane.b32.xlu0 %v2881_v33, 368  ;;  %v548_v24 = vadd.f32 %v4531_v52, %v3778_v38  ;;  %v1139_v34 = vrot.slane %v1138_v49, 4 }
 0x21e   :  { %v2505_v14 = vpop.eup %2504  ;;  %v1646_v56 = vrot.slane %v1645_v35, 4  ;;  %v1652_v51 = vadd.f32 %v2503_v28, %v2501_v47  ;;  %2522 = vtanh.f32 %v1496_v48  ;;  %v1130_v17 = vrot.slane %v1129_v27, 1  ;;  %v4536_v28 = vld [vmem:[#allocation92_spill] sm:$0xff] }
 0x21f   :  { %v2507_v42 = vpop.eup %2506  ;;  %2524 = vtanh.f32 %v1495_v13  ;;  %v1680_v63 = vpop.permute.xlu1 %1679  ;;  %v4532_v37 = vsub.f32 %v4502_v22, %v4501_v16  ;;  %v1564_v2 = vadd.f32 %v2499_v54, %v1563_v6  ;;  %v643_v5 = vrot.slane %v642_v20, 4 }
 0x220   :  { %v2509_v60 = vpop.eup %2508  ;;  %v1647_v10 = vadd.f32 %v1646_v56, %v1645_v35  ;;  %v1930_v9 = vsub.f32 %v1680_v63, %v2875_v31  ;;  %v1676_v0 = vpop.permute.xlu0 %1675  ;;  %v634_v38 = vrot.slane %v633_v57, 1  ;;  %v1045_v26 = vadd.f32 %v4533_v1, %v1044_v32 }
 0x221   :  { %2526 = vtanh.f32 %v4532_v37  ;;  %v2511_v59 = vpop.eup %2510  ;;  %v1929_v43 = vsub.f32 %v1676_v0, %v2875_v31  ;;  %1891 = vbcast.lane.b32.xlu1 %v2894_v40, 368  ;;  %1831 = vbcast.lane.b32.xlu0 %v4491_v61, 376  ;;  %v549_v12 = vadd.f32 %v4534_v11, %v548_v24  ;;  %v1140_v29 = vadd.f32 %v1139_v34, %v1138_v49  ;;  %v4537_v34 = vld [vmem:[#allocation20_spill] sm:$0xff]  ;;  %v4538_v0 = vld [vmem:[#allocation91_spill] sm:$0xff] }
 0x222   :  { %2528 = vtanh.f32 %v433_v4  ;;  %v1648_v23 = vrot.slane %v1647_v10, 2  ;;  %v1653_v46 = vadd.f32 %v2511_v59, %v1652_v51  ;;  %v2513_v22 = vpop.eup %2512  ;;  %v1131_v18 = vadd.f32 %v1130_v17, %v1129_v27  ;;  %v4535_v4 = vld [vmem:[#allocation19_spill] sm:$0xff] }
 0x223   :  { %2530 = vtanh.f32 %v1930_v9  ;;  %v1688_v36 = vpop.permute.xlu1 %1687  ;;  %v1565_v62 = vadd.f32 %v2507_v42, %v1564_v2  ;;  %v436_v19 = vsub.f32 %v4535_v4, %v4501_v16  ;;  %v644_v47 = vadd.f32 %v643_v5, %v642_v20 }
 0x224   :  { %2532 = vtanh.f32 %v1929_v43  ;;  %v2515_v53 = vpop.eup %2514  ;;  %v1654_v15 = vadd.f32 %v2509_v60, %v1653_v46  ;;  %v1932_v55 = vsub.f32 %v1688_v36, %v2875_v31  ;;  %v1684_v25 = vpop.permute.xlu0 %1683  ;;  %v1649_v54 = vadd.f32 %v1648_v23, %v1647_v10 }
 0x225   :  { %v2517_v21 = vpop.eup %2516  ;;  %v1931_v61 = vsub.f32 %v1684_v25, %v2875_v31  ;;  %1923 = vbcast.lane.b32.xlu1 %v2897_v41, 368  ;;  %v635_v49 = vadd.f32 %v634_v38, %v633_v57  ;;  %v1046_v35 = vadd.f32 %v2505_v14, %v1045_v26  ;;  %1863 = vbcast.lane.b32.xlu0 %v2881_v33, 376  ;;  %v1141_v32 = vrot.slane %v1140_v29, 2 }
 0x226   :  { %v2519_v6 = vpop.eup %2518  ;;  %v1655_v27 = vadd.f32 %v2517_v21, %v1654_v15  ;;  %2534 = vtanh.f32 %v1932_v55  ;;  %v1650_v48 = vrot.slane %v1649_v54, 1  ;;  %v550_v8 = vadd.f32 %v4536_v28, %v549_v12 }
 0x227   :  { %v2521_v58 = vpop.eup %2520  ;;  %2536 = vtanh.f32 %v1931_v61  ;;  %v1696_v13 = vpop.permute.xlu1 %1695  ;;  %v1151_v56 = vadd.f32 %v1131_v18, %v635_v49  ;;  %v1566_v51 = vadd.f32 %v2513_v22, %v1565_v62  ;;  %v435_v33 = vsub.f32 %v4537_v34, %v4501_v16 }
 0x228   :  { %v2523_v20 = vpop.eup %2522  ;;  %v1656_v42 = vadd.f32 %v2515_v53, %v1655_v27  ;;  %v1934_v52 = vsub.f32 %v1696_v13, %v2875_v31  ;;  %v1692_v57 = vpop.permute.xlu0 %1691  ;;  %v1651_v24 = vadd.f32 %v1650_v48, %v1649_v54  ;;  %2538 = vtanh.f32 %v436_v19  ;;  %v4541_v19 = vld [vmem:[#allocation13_spill] sm:$0xff] }
 0x229   :  { %v2525_v14 = vpop.eup %2524  ;;  %v1933_v63 = vsub.f32 %v1692_v57, %v2875_v31  ;;  %1927 = vbcast.lane.b32.xlu1 %v2897_v41, 376  ;;  %v645_v17 = vrot.slane %v644_v47, 2  ;;  %v1047_v37 = vadd.f32 %v2519_v6, %v1046_v35  ;;  %1895 = vbcast.lane.b32.xlu0 %v2894_v40, 376  ;;  %v551_v59 = vadd.f32 %v4538_v0, %v550_v8  ;;  %v4539_v41 = vld [vmem:[#allocation21_spill] sm:$0xff]  ;;  %v4540_v40 = vld [vmem:[#allocation22_spill] sm:$0xff] }
 0x22a   :  { %v1657_v2 = vadd.f32 %v2525_v14, %v1656_v42  ;;  %2540 = vtanh.f32 %v1934_v52  ;;  %v4018_v10 = vadd.f32 %v1651_v24, %v1151_v56  ;;  %v1142_v43 = vadd.f32 %v1141_v32, %v1140_v29  ;;  %v4543_v32 = vld [vmem:[#allocation24_spill] sm:$0xff] }
 0x22b   :  { %v4015_v60 = vpop.eup %2526  ;;  %2542 = vtanh.f32 %v1933_v63  ;;  %v1704_v5 = vpop.permute.xlu1 %1703  ;;  %v438_v1 = vsub.f32 %v4539_v41, %v4501_v16  ;;  %v1567_v26 = vadd.f32 %v2521_v58, %v1566_v51  ;;  %v437_v12 = vsub.f32 %v4540_v40, %v4501_v16  ;;  %v4544_v63 = vld [vmem:[#allocation46_spill] sm:$0xff]  ;;  %v4545_v41 = vld [vmem:[#allocation47_spill] sm:$0xff] }
 0x22c   :  { %v4020_v9 = vpop.eup %2528  ;;  %v1658_v23 = vadd.f32 %v2523_v20, %v1657_v2  ;;  %v1936_v46 = vsub.f32 %v1704_v5, %v2875_v31  ;;  %v1700_v22 = vpop.permute.xlu0 %1699  ;;  %2544 = vtanh.f32 %v435_v33  ;;  %v646_v18 = vadd.f32 %v645_v17, %v644_v47  ;;  %v4546_v40 = vld [vmem:[#allocation15_spill] sm:$0xff] }
 0x22d   :  { %v2531_v38 = vpop.eup %2530  ;;  %v1935_v36 = vsub.f32 %v1700_v22, %v2875_v31  ;;  %v1048_v53 = vrot.slane %v1047_v37, 4  ;;  %v552_v15 = vrot.slane %v551_v59, 4  ;;  %v1143_v25 = vrot.slane %v1142_v43, 1  ;;  %v4542_v31 = vld [vmem:[#allocation23_spill] sm:$0xff] }
 0x22e   :  { %v2533_v11 = vpop.eup %2532  ;;  %v1659_v62 = vrot.slane %v1658_v23, 4  ;;  %2546 = vtanh.f32 %v1936_v46  ;;  %v1568_v21 = vrot.slane %v1567_v26, 4  ;;  %v440_v47 = vsub.f32 %v4542_v31, %v4501_v16 }
 0x22f   :  { %v2057_v29 = vadd.f32 %v2533_v11, %v2531_v38  ;;  %2548 = vtanh.f32 %v1935_v36  ;;  %v1712_v55 = vpop.permute.xlu1 %1711  ;;  %v647_v27 = vrot.slane %v646_v18, 1  ;;  %v1049_v48 = vadd.f32 %v1048_v53, %v1047_v37 }
 0x230   :  { %v2535_v54 = vpop.eup %2534  ;;  %2550 = vtanh.f32 %v438_v1  ;;  %v1660_v4 = vadd.f32 %v1659_v62, %v1658_v23  ;;  %v1938_v61 = vsub.f32 %v1712_v55, %v4541_v19  ;;  %v1708_v49 = vpop.permute.xlu0 %1707  ;;  %v553_v13 = vadd.f32 %v552_v15, %v551_v59 }
 0x231   :  { %v2537_v6 = vpop.eup %2536  ;;  %2552 = vtanh.f32 %v437_v12  ;;  %v1937_v35 = vsub.f32 %v1708_v49, %v4541_v19  ;;  %v439_v56 = vsub.f32 %v4543_v32, %v4501_v16  ;;  %v1144_v51 = vadd.f32 %v1143_v25, %v1142_v43 }
 0x232   :  { %v2058_v58 = vadd.f32 %v2537_v6, %v2057_v29  ;;  %2554 = vtanh.f32 %v1938_v61  ;;  %v1661_v28 = vrot.slane %v1660_v4, 2  ;;  %v4033_v8 = vpop.eup %2538  ;;  %v1569_v52 = vadd.f32 %v1568_v21, %v1567_v26 }
 0x233   :  { %2556 = vtanh.f32 %v1937_v35  ;;  %v1744_v20 = vpop.permute.xlu1 %1743  ;;  %v922_v17 = vsub.f32 %v4544_v63, %v4541_v19  ;;  %v648_v2 = vadd.f32 %v647_v27, %v646_v18  ;;  %v1050_v0 = vrot.slane %v1049_v48, 2  ;;  %v4547_v27 = vld [vmem:[#allocation48_spill] sm:$0xff] }
 0x234   :  { %v2541_v42 = vpop.eup %2540  ;;  %v2059_v57 = vadd.f32 %v2535_v54, %v2058_v58  ;;  %v1946_v24 = vsub.f32 %v1744_v20, %v4501_v16  ;;  %v1740_v14 = vpop.permute.xlu0 %1739  ;;  %v1662_v34 = vadd.f32 %v1661_v28, %v1660_v4  ;;  %2558 = vtanh.f32 %v440_v47 }
 0x235   :  { %v2543_v33 = vpop.eup %2542  ;;  %v1945_v37 = vsub.f32 %v1740_v14, %v4501_v16  ;;  %v554_v38 = vrot.slane %v553_v13, 2  ;;  %v921_v1 = vsub.f32 %v4545_v41, %v4541_v19  ;;  %v1152_v23 = vadd.f32 %v1144_v51, %v648_v2 }
 0x236   :  { %v2060_v59 = vadd.f32 %v2543_v33, %v2059_v57  ;;  %2560 = vtanh.f32 %v1946_v24  ;;  %v1663_v5 = vrot.slane %v1662_v34, 1  ;;  %v4041_v43 = vpop.eup %2544  ;;  %v1570_v22 = vrot.slane %v1569_v52, 2 }
 0x237   :  { %2562 = vtanh.f32 %v1945_v37  ;;  %v1772_v26 = vpop.permute.xlu1 %1771  ;;  %v1051_v15 = vadd.f32 %v1050_v0, %v1049_v48  ;;  %v555_v21 = vadd.f32 %v554_v38, %v553_v13  ;;  %v924_v48 = vsub.f32 %v4547_v27, %v4541_v19 }
 0x238   :  { %v2547_v46 = vpop.eup %2546  ;;  %v2061_v11 = vadd.f32 %v2541_v42, %v2060_v59  ;;  %v1953_v12 = vsub.f32 %v1772_v26, %v4546_v40  ;;  %v1716_v36 = vpop.permute.xlu0 %1715  ;;  %v1664_v18 = vadd.f32 %v1663_v5, %v1662_v34  ;;  %2564 = vtanh.f32 %v439_v56 }
 0x239   :  { %v2549_v53 = vpop.eup %2548  ;;  %v1939_v62 = vsub.f32 %v1716_v36, %v4541_v19  ;;  %2566 = vtanh.f32 %v922_v17  ;;  %v1571_v49 = vadd.f32 %v1570_v22, %v1569_v52  ;;  %v1052_v28 = vrot.slane %v1051_v15, 1  ;;  %v4548_v52 = vld [vmem:[#allocation49_spill] sm:$0xff]  ;;  %v4549_v17 = vld [vmem:[#allocation50_spill] sm:$0xff]  ;;  %v4550_v36 = vld [vmem:[#allocation51_spill] sm:$0xff] }
 0x23a   :  { %v4047_v29 = vpop.eup %2550  ;;  %v2062_v55 = vadd.f32 %v2549_v53, %v2061_v11  ;;  %v4049_v25 = vadd.f32 %v1664_v18, %v1152_v23  ;;  %v556_v20 = vrot.slane %v555_v21, 1  ;;  %v923_v57 = vsub.f32 %v4548_v52, %v4541_v19 }
 0x23b   :  { %v4051_v54 = vpop.eup %2552  ;;  %2568 = vtanh.f32 %v1939_v62  ;;  %v1748_v4 = vpop.permute.xlu1 %1747  ;;  %v1572_v24 = vrot.slane %v1571_v49, 1  ;;  %v926_v37 = vsub.f32 %v4549_v17, %v4541_v19  ;;  %v1053_v0 = vadd.f32 %v1052_v28, %v1051_v15  ;;  %v4552_v28 = vld [vmem:[#allocation54_spill] sm:$0xff] }
 0x23c   :  { %v2555_v61 = vpop.eup %2554  ;;  %2570 = vtanh.f32 %v921_v1  ;;  %v2063_v6 = vadd.f32 %v2547_v46, %v2062_v55  ;;  %v1947_v31 = vsub.f32 %v1748_v4, %v4501_v16  ;;  %v1776_v47 = vpop.permute.xlu0 %1775  ;;  %v557_v41 = vadd.f32 %v556_v20, %v555_v21 }
 0x23d   :  { %v2557_v35 = vpop.eup %2556  ;;  %2572 = vtanh.f32 %v1953_v12  ;;  %v1954_v58 = vsub.f32 %v1776_v47, %v4546_v40  ;;  %v1573_v23 = vadd.f32 %v1572_v24, %v1571_v49  ;;  %v925_v18 = vsub.f32 %v4550_v36, %v4541_v19 }
 0x23e   :  { %v2064_v32 = vrot.slane %v2063_v6, 4  ;;  %v2070_v56 = vadd.f32 %v2557_v35, %v2555_v61  ;;  %2574 = vtanh.f32 %v1947_v31  ;;  %v4057_v13 = vpop.eup %2558  ;;  %v1145_v15 = vadd.f32 %v1053_v0, %v557_v41 }
 0x23f   :  { %2576 = vtanh.f32 %v1954_v58  ;;  %v1808_v51 = vpop.permute.xlu1 %1807 }
 0x240   :  { %v2561_v42 = vpop.eup %2560  ;;  %v2065_v14 = vadd.f32 %v2064_v32, %v2063_v6  ;;  %v1962_v34 = vsub.f32 %v1808_v51, %v2891_v39  ;;  %v1804_v33 = vpop.permute.xlu0 %1803  ;;  %2578 = vtanh.f32 %v924_v48  ;;  %v4551_v6 = vld [vmem:[#allocation53_spill] sm:$0xff]  ;;  %v1665_v47 = vadd.f32 %v1573_v23, %v1145_v15 }
 0x241   :  { %v2563_v63 = vpop.eup %2562  ;;  %v1961_v2 = vsub.f32 %v1804_v33, %v2891_v39  ;;  %v928_v31 = vsub.f32 %v4551_v6, %v4541_v19  ;;  %v927_v32 = vsub.f32 %v4552_v28, %v4541_v19 }
 0x242   :  { %v2066_v59 = vrot.slane %v2065_v14, 2  ;;  %v2083_v5 = vadd.f32 %v2563_v63, %v2561_v42  ;;  %2580 = vtanh.f32 %v1962_v34  ;;  %v4065_v38 = vpop.eup %2564 }
 0x243   :  { %2582 = vtanh.f32 %v1961_v2  ;;  %v1780_v1 = vpop.permute.xlu1 %1779  ;;  %v4067_v26 = vpop.eup %2566 }
 0x244   :  { %2584 = vtanh.f32 %v923_v57  ;;  %v2067_v46 = vadd.f32 %v2066_v59, %v2065_v14  ;;  %v1955_v22 = vsub.f32 %v1780_v1, %v4546_v40  ;;  %v1720_v11 = vpop.permute.xlu0 %1719  ;;  %v4553_v14 = vld [vmem:[#allocation55_spill] sm:$0xff] }
 0x245   :  { %v2569_v12 = vpop.eup %2568  ;;  %2586 = vtanh.f32 %v926_v37  ;;  %v1940_v53 = vsub.f32 %v1720_v11, %v4541_v19  ;;  %v930_v34 = vsub.f32 %v4553_v14, %v4501_v16  ;;  %v4554_v37 = vld [vmem:[#allocation56_spill] sm:$0xff] }
 0x246   :  { %v4073_v62 = vpop.eup %2570  ;;  %v2068_v55 = vrot.slane %v2067_v46, 1  ;;  %v2071_v21 = vadd.f32 %v2569_v12, %v2070_v56  ;;  %2588 = vtanh.f32 %v1955_v22  ;;  %v929_v2 = vsub.f32 %v4554_v37, %v4501_v16 }
 0x247   :  { %v2573_v4 = vpop.eup %2572  ;;  %2590 = vtanh.f32 %v1940_v53  ;;  %v1840_v61 = vpop.permute.xlu1 %1839 }
 0x248   :  { %v2575_v49 = vpop.eup %2574  ;;  %v2069_v35 = vadd.f32 %v2068_v55, %v2067_v46  ;;  %v1970_v27 = vsub.f32 %v1840_v61, %v2904_v44  ;;  %v1836_v48 = vpop.permute.xlu0 %1835  ;;  %2592 = vtanh.f32 %v925_v18  ;;  %v4555_v46 = vld [vmem:[#allocation57_spill] sm:$0xff]  ;;  %v4556_v18 = vld [vmem:[#allocation27_spill] sm:$0xff] }
 0x249   :  { %v2577_v58 = vpop.eup %2576  ;;  %v4080_v20 = vadd.f32 %v2575_v49, %v2083_v5  ;;  %v1969_v56 = vsub.f32 %v1836_v48, %v2904_v44  ;;  %v932_v22 = vsub.f32 %v4555_v46, %v4501_v16  ;;  %v1442_v53 = vsub.f32 %v4556_v18, %v4541_v19 }
 0x24a   :  { %v4083_v51 = vadd.f32 %v2069_v35, %v1665_v47  ;;  %v2096_v42 = vadd.f32 %v2577_v58, %v2573_v4  ;;  %2594 = vtanh.f32 %v1970_v27  ;;  %v4085_v52 = vpop.eup %2578  ;;  %v4558_v58 = vld [vmem:[#allocation58_spill] sm:$0xff] }
 0x24b   :  { %2596 = vtanh.f32 %v1969_v56  ;;  %v1812_v57 = vpop.permute.xlu1 %1811  ;;  %v931_v28 = vsub.f32 %v4558_v58, %v4501_v16  ;;  %v4559_v56 = vld [vmem:[#allocation16_spill] sm:$0xff] }
 0x24c   :  { %v2581_v24 = vpop.eup %2580  ;;  %2598 = vtanh.f32 %v928_v31  ;;  %v1963_v33 = vsub.f32 %v1812_v57, %v2891_v39  ;;  %v1752_v63 = vpop.permute.xlu0 %1751  ;;  %v4557_v31 = vld [vmem:[#allocation28_spill] sm:$0xff] }
 0x24d   :  { %v2583_v17 = vpop.eup %2582  ;;  %2600 = vtanh.f32 %v927_v32  ;;  %v1948_v0 = vsub.f32 %v1752_v63, %v4501_v16  ;;  %v1441_v47 = vsub.f32 %v4557_v31, %v4541_v19 }
 0x24e   :  { %v4093_v59 = vpop.eup %2584  ;;  %v2109_v5 = vadd.f32 %v2583_v17, %v2581_v24  ;;  %2602 = vtanh.f32 %v1963_v33  ;;  %v4560_v33 = vld [vmem:[#allocation59_spill] sm:$0xff] }
 0x24f   :  { %v4095_v41 = vpop.eup %2586  ;;  %2604 = vtanh.f32 %v1948_v0  ;;  %v1872_v1 = vpop.permute.xlu1 %1871  ;;  %v934_v63 = vsub.f32 %v4560_v33, %v4501_v16 }
 0x250   :  { %v2589_v23 = vpop.eup %2588  ;;  %2606 = vtanh.f32 %v930_v34  ;;  %v1978_v11 = vsub.f32 %v1872_v1, %v2907_v45  ;;  %v1868_v12 = vpop.permute.xlu0 %1867 }
 0x251   :  { %v2591_v36 = vpop.eup %2590  ;;  %2608 = vtanh.f32 %v929_v2  ;;  %v4102_v15 = vadd.f32 %v2589_v23, %v2096_v42  ;;  %v1977_v55 = vsub.f32 %v1868_v12, %v2907_v45  ;;  %v1443_v42 = vsub.f32 %v4559_v56, %v4541_v19  ;;  %v4561_v2 = vld [vmem:[#allocation29_spill] sm:$0xff]  ;;  %v4562_v12 = vld [vmem:[#allocation31_spill] sm:$0xff]  ;;  %v4567_v56 = vld [vmem:[#allocation98_spill] sm:$0xff] }
 0x252   :  { %v4105_v4 = vadd.f32 %v2591_v36, %v2071_v21  ;;  %2610 = vtanh.f32 %v1978_v11  ;;  %v4107_v61 = vpop.eup %2592  ;;  %v1444_v0 = vsub.f32 %v4561_v2, %v4541_v19  ;;  %v1445_v36 = vsub.f32 %v4562_v12, %v4541_v19 }
 0x253   :  { %2612 = vtanh.f32 %v1977_v55  ;;  %v1784_v49 = vpop.permute.xlu1 %1783 }
 0x254   :  { %v2595_v6 = vpop.eup %2594  ;;  %2614 = vtanh.f32 %v932_v22  ;;  %v1956_v35 = vsub.f32 %v1784_v49, %v4546_v40  ;;  %v1724_v27 = vpop.permute.xlu0 %1723 }
 0x255   :  { %v2597_v48 = vpop.eup %2596  ;;  %2616 = vtanh.f32 %v1442_v53  ;;  %v1941_v21 = vsub.f32 %v1724_v27, %v4541_v19  ;;  %v4566_v27 = vld [vmem:[#allocation65_spill] sm:$0xff] }
 0x256   :  { %v4115_v32 = vpop.eup %2598  ;;  %v4119_v57 = vadd.f32 %v2597_v48, %v2595_v6  ;;  %2618 = vtanh.f32 %v1956_v35  ;;  %v1449_v48 = vsub.f32 %v4566_v27, %v4501_v16  ;;  %v4571_v27 = vld [vmem:[#allocation37_spill] sm:$0xff] }
 0x257   :  { %v4121_v24 = vpop.eup %2600  ;;  %2620 = vtanh.f32 %v1941_v21  ;;  %v4123_v14 = vpop.permute.xlu1 %1899 }
 0x258   :  { %v2603_v34 = vpop.eup %2602  ;;  %2622 = vtanh.f32 %v1441_v47  ;;  %v1844_v17 = vpop.permute.xlu0 %1843  ;;  %v4564_v47 = vld [vmem:[#allocation93_spill] sm:$0xff] }
 0x259   :  { %v2605_v37 = vpop.eup %2604  ;;  %2624 = vtanh.f32 %v931_v28  ;;  %v4129_v1 = vadd.f32 %v2603_v34, %v2109_v5  ;;  %v1971_v23 = vsub.f32 %v1844_v17, %v2904_v44  ;;  %v4563_v5 = vld [vmem:[#allocation34_spill] sm:$0xff] }
 0x25a   :  { %v4132_v46 = vpop.eup %2606  ;;  %2626 = vtanh.f32 %v1443_v42  ;;  %v4135_v22 = vadd.f32 %v2605_v37, %v4080_v20  ;;  %v1450_v55 = vsub.f32 %v4563_v5, %v4501_v16  ;;  %v4565_v20 = vld [vmem:[#allocation95_spill] sm:$0xff] }
 0x25b   :  { %v4137_v11 = vpop.eup %2608  ;;  %2628 = vtanh.f32 %v1971_v23  ;;  %v1756_v18 = vpop.permute.xlu1 %1755  ;;  %v558_v35 = vadd.f32 %v4565_v20, %v4564_v47  ;;  %v4569_v23 = vld [vmem:[#allocation30_spill] sm:$0xff] }
 0x25c   :  { %v2611_v53 = vpop.eup %2610  ;;  %2630 = vtanh.f32 %v934_v63  ;;  %v1949_v49 = vsub.f32 %v1756_v18, %v4501_v16  ;;  %v4144_v6 = vpop.permute.xlu0 %1903  ;;  %v4568_v63 = vld [vmem:[#allocation38_spill] sm:$0xff]  ;;  %v1446_v12 = vsub.f32 %v4569_v23, %v4541_v19  ;;  %v4574_v23 = vld [vmem:[#allocation101_spill] sm:$0xff] }
 0x25d   :  { %v2613_v31 = vpop.eup %2612  ;;  %2632 = vtanh.f32 %v1444_v0  ;;  %v559_v42 = vadd.f32 %v4567_v56, %v558_v35  ;;  %v1451_v17 = vsub.f32 %v4568_v63, %v4501_v16  ;;  %v1054_v35 = vadd.f32 %v4073_v62, %v4067_v26  ;;  %v4573_v26 = vld [vmem:[#allocation32_spill] sm:$0xff] }
 0x25e   :  { %v4150_v58 = vpop.eup %2614  ;;  %v4152_v28 = vadd.f32 %v2613_v31, %v2611_v53  ;;  %2634 = vtanh.f32 %v1949_v49  ;;  %v4570_v49 = vld [vmem:[#allocation97_spill] sm:$0xff]  ;;  %v1447_v62 = vsub.f32 %v4573_v26, %v4541_v19 }
 0x25f   :  { %v2617_v21 = vpop.eup %2616  ;;  %2636 = vtanh.f32 %v1445_v36  ;;  %v1876_v34 = vpop.permute.xlu1 %1875  ;;  %v560_v31 = vadd.f32 %v4570_v49, %v559_v42 }
 0x260   :  { %v2619_v33 = vpop.eup %2618  ;;  %2638 = vtanh.f32 %v1450_v55  ;;  %v1979_v37 = vsub.f32 %v1876_v34, %v2907_v45  ;;  %v1816_v2 = vpop.permute.xlu0 %1815 }
 0x261   :  { %v2621_v0 = vpop.eup %2620  ;;  %2640 = vtanh.f32 %v1449_v48  ;;  %v4161_v18 = vadd.f32 %v2619_v33, %v4102_v15  ;;  %v1964_v53 = vsub.f32 %v1816_v2, %v2891_v39  ;;  %v1452_v15 = vsub.f32 %v4571_v27, %v4501_v16  ;;  %v4576_v27 = vld [vmem:[#allocation64_spill] sm:$0xff] }
 0x262   :  { %v2623_v36 = vpop.eup %2622  ;;  %v4165_v5 = vadd.f32 %v2621_v0, %v4105_v4  ;;  %2642 = vtanh.f32 %v1979_v37  ;;  %v4572_v4 = vld [vmem:[#allocation60_spill] sm:$0xff]  ;;  %v1055_v2 = vadd.f32 %v4093_v59, %v1054_v35 }
 0x263   :  { %v2625_v55 = vpop.eup %2624  ;;  %2644 = vtanh.f32 %v1964_v53  ;;  %v1788_v47 = vpop.permute.xlu1 %1787  ;;  %v933_v33 = vsub.f32 %v4572_v4, %v4501_v16  ;;  %v1574_v63 = vadd.f32 %v2623_v36, %v2617_v21  ;;  %v561_v53 = vadd.f32 %v4574_v23, %v560_v31  ;;  %v4575_v36 = vld [vmem:[#allocation67_spill] sm:$0xff] }
 0x264   :  { %v2627_v20 = vpop.eup %2626  ;;  %2646 = vtanh.f32 %v1451_v17  ;;  %v1957_v48 = vsub.f32 %v1788_v47, %v4546_v40  ;;  %v1728_v56 = vpop.permute.xlu0 %1727  ;;  %v1453_v47 = vsub.f32 %v4575_v36, %v4501_v16  ;;  %v4578_v23 = vld [vmem:[#allocation63_spill] sm:$0xff] }
 0x265   :  { %v2629_v34 = vpop.eup %2628  ;;  %2648 = vtanh.f32 %v1446_v12  ;;  %v1942_v42 = vsub.f32 %v1728_v56, %v4541_v19  ;;  %v1575_v49 = vadd.f32 %v2627_v20, %v1574_v63  ;;  %v1056_v56 = vadd.f32 %v4085_v52, %v1055_v2 }
 0x266   :  { %v4176_v37 = vpop.eup %2630  ;;  %v4182_v17 = vadd.f32 %v2629_v34, %v4119_v57  ;;  %2650 = vtanh.f32 %v1957_v48  ;;  %v1448_v57 = vsub.f32 %v4576_v27, %v4541_v19  ;;  %v571_v63 = vadd.f32 %v4020_v9, %v4015_v60 }
 0x267   :  { %v2633_v0 = vpop.eup %2632  ;;  %2652 = vtanh.f32 %v1942_v42  ;;  %v4185_v21 = vpop.permute.xlu1 %1907 }
 0x268   :  { %v2635_v12 = vpop.eup %2634  ;;  %2654 = vtanh.f32 %v1452_v15  ;;  %v1848_v59 = vpop.permute.xlu0 %1847  ;;  %v4577_v15 = vld [vmem:[#allocation99_spill] sm:$0xff]  ;;  %v1576_v42 = vadd.f32 %v2633_v0, %v1575_v49  ;;  %v572_v49 = vadd.f32 %v4041_v43, %v571_v63 }
 0x269   :  { %v2637_v35 = vpop.eup %2636  ;;  %2656 = vtanh.f32 %v933_v33  ;;  %v4192_v48 = vadd.f32 %v2635_v12, %v4135_v22  ;;  %v1972_v31 = vsub.f32 %v1848_v59, %v2904_v44  ;;  %v562_v4 = vadd.f32 %v4577_v15, %v561_v53  ;;  %v4579_v12 = vld [vmem:[#allocation68_spill] sm:$0xff] }
 0x26a   :  { %v2639_v20 = vpop.eup %2638  ;;  %2658 = vtanh.f32 %v1447_v62  ;;  %v935_v22 = vsub.f32 %v4578_v23, %v4501_v16  ;;  %v1454_v36 = vsub.f32 %v4579_v12, %v4501_v16  ;;  %v1067_v53 = vadd.f32 %v4137_v11, %v4132_v46 }
 0x26b   :  { %v2641_v34 = vpop.eup %2640  ;;  %2660 = vtanh.f32 %v1972_v31  ;;  %v1820_v33 = vpop.permute.xlu1 %1819  ;;  %v1057_v59 = vadd.f32 %v4107_v61, %v1056_v56  ;;  %v1577_v15 = vadd.f32 %v2637_v35, %v1576_v42 }
 0x26c   :  { %v2643_v26 = vpop.eup %2642  ;;  %2662 = vtanh.f32 %v1453_v47  ;;  %v1965_v52 = vsub.f32 %v1820_v33, %v2891_v39  ;;  %v1760_v2 = vpop.permute.xlu0 %1759  ;;  %v1068_v31 = vadd.f32 %v2625_v55, %v1067_v53  ;;  %v1587_v33 = vadd.f32 %v2641_v34, %v2639_v20  ;;  %v4583_v53 = vld [vmem:[#allocation40_spill] sm:$0xff] }
 0x26d   :  { %v2645_v62 = vpop.eup %2644  ;;  %2664 = vtanh.f32 %v1448_v57  ;;  %v4207_v60 = vadd.f32 %v2643_v26, %v4152_v28  ;;  %v1950_v9 = vsub.f32 %v1760_v2, %v4501_v16  ;;  %v4580_v28 = vld [vmem:[#allocation62_spill] sm:$0xff]  ;;  %v573_v34 = vadd.f32 %v4033_v8, %v572_v49 }
 0x26e   :  { %v2647_v0 = vpop.eup %2646  ;;  %v2111_v47 = vadd.f32 %v2645_v62, %v4129_v1  ;;  %2666 = vtanh.f32 %v1965_v52  ;;  %v936_v57 = vsub.f32 %v4580_v28, %v4501_v16  ;;  %v4581_v26 = vld [vmem:[#allocation70_spill] sm:$0xff]  ;;  %v1058_v12 = vadd.f32 %v4095_v41, %v1057_v59  ;;  %v4582_v62 = vld [vmem:[#allocation104_spill] sm:$0xff]  ;;  %v4584_v28 = vld [vmem:[#allocation103_spill] sm:$0xff] }
 0x26f   :  { %v2649_v27 = vpop.eup %2648  ;;  %2668 = vtanh.f32 %v1950_v9  ;;  %v1732_v46 = vpop.permute.xlu1 %1731  ;;  %v1455_v23 = vsub.f32 %v4581_v26, %v4501_v16  ;;  %v1588_v1 = vadd.f32 %v2647_v0, %v1587_v33  ;;  %v1456_v9 = vsub.f32 %v4583_v53, %v4501_v16 }
 0x270   :  { %v2651_v11 = vpop.eup %2650  ;;  %2670 = vtanh.f32 %v1454_v36  ;;  %v1943_v43 = vsub.f32 %v1732_v46, %v4541_v19  ;;  %v1880_v61 = vpop.permute.xlu0 %1879  ;;  %v1069_v36 = vadd.f32 %v4150_v58, %v1068_v31  ;;  %v1578_v52 = vadd.f32 %v2649_v27, %v1577_v15 }
 0x271   :  { %v2653_v56 = vpop.eup %2652  ;;  %2672 = vtanh.f32 %v935_v22  ;;  %v4219_v55 = vadd.f32 %v2651_v11, %v4161_v18  ;;  %v1980_v35 = vsub.f32 %v1880_v61, %v2907_v45  ;;  %v563_v18 = vadd.f32 %v4582_v62, %v562_v4 }
 0x272   :  { %v2655_v20 = vpop.eup %2654  ;;  %v2074_v63 = vadd.f32 %v2653_v56, %v4165_v5  ;;  %2674 = vtanh.f32 %v1943_v43  ;;  %v574_v58 = vadd.f32 %v4051_v54, %v573_v34  ;;  %v1059_v4 = vadd.f32 %v4121_v24, %v1058_v12 }
 0x273   :  { %v2657_v42 = vpop.eup %2656  ;;  %2676 = vtanh.f32 %v1980_v35  ;;  %v1852_v22 = vpop.permute.xlu1 %1851  ;;  %v1589_v49 = vadd.f32 %v2655_v20, %v1588_v1  ;;  %v564_v26 = vadd.f32 %v4584_v28, %v563_v18 }
 0x274   :  { %v2659_v2 = vpop.eup %2658  ;;  %2678 = vtanh.f32 %v1455_v23  ;;  %v1973_v8 = vsub.f32 %v1852_v22, %v2904_v44  ;;  %v1792_v0 = vpop.permute.xlu0 %1791  ;;  %v1070_v15 = vadd.f32 %v2657_v42, %v1069_v36  ;;  %v575_v56 = vadd.f32 %v4047_v29, %v574_v58 }
 0x275   :  { %v2661_v5 = vpop.eup %2660  ;;  %2680 = vtanh.f32 %v936_v57  ;;  %v1958_v41 = vsub.f32 %v1792_v0, %v4546_v40  ;;  %v1579_v33 = vadd.f32 %v2659_v2, %v1578_v52  ;;  %v1060_v35 = vadd.f32 %v4115_v32, %v1059_v4 }
 0x276   :  { %v2663_v59 = vpop.eup %2662  ;;  %v2124_v27 = vadd.f32 %v2661_v5, %v4182_v17  ;;  %2682 = vtanh.f32 %v1973_v8  ;;  %v1071_v20 = vadd.f32 %v4176_v37, %v1070_v15  ;;  %v565_v36 = vrot.slane %v564_v26, 4 }
 0x277   :  { %v2665_v31 = vpop.eup %2664  ;;  %2684 = vtanh.f32 %v1958_v41  ;;  %v1764_v46 = vpop.permute.xlu1 %1763  ;;  %v1590_v54 = vadd.f32 %v2663_v59, %v1589_v49  ;;  %v576_v18 = vadd.f32 %v4065_v38, %v575_v56  ;;  %v1061_v53 = vrot.slane %v1060_v35, 4 }
 0x278   :  { %v2667_v11 = vpop.eup %2666  ;;  %2686 = vtanh.f32 %v1456_v9  ;;  %v1951_v57 = vsub.f32 %v1764_v46, %v4501_v16  ;;  %v4236_v23 = vpop.permute.xlu0 %1911  ;;  %v1580_v34 = vadd.f32 %v2665_v31, %v1579_v33  ;;  %v566_v49 = vadd.f32 %v565_v36, %v564_v26 }
 0x279   :  { %v2669_v43 = vpop.eup %2668  ;;  %v4238_v61 = vadd.f32 %v2667_v11, %v2111_v47  ;;  %v1062_v33 = vadd.f32 %v1061_v53, %v1060_v35 }
 0x27a   :  { %v2671_v17 = vpop.eup %2670  ;;  %v2087_v24 = vadd.f32 %v2669_v43, %v4192_v48  ;;  %2688 = vtanh.f32 %v1951_v57  ;;  %v1581_v8 = vrot.slane %v1580_v34, 4  ;;  %v567_v57 = vrot.slane %v566_v49, 2 }
 0x27b   :  { %v2673_v1 = vpop.eup %2672  ;;  %v1884_v42 = vpop.permute.xlu1 %1883  ;;  %v1591_v2 = vadd.f32 %v2671_v17, %v1590_v54  ;;  %v1063_v56 = vrot.slane %v1062_v33, 2 }
 0x27c   :  { %v2675_v12 = vpop.eup %2674  ;;  %v1981_v52 = vsub.f32 %v1884_v42, %v2907_v45  ;;  %v1824_v22 = vpop.permute.xlu0 %1823  ;;  %v1072_v9 = vadd.f32 %v2673_v1, %v1071_v20  ;;  %v1582_v11 = vadd.f32 %v1581_v8, %v1580_v34  ;;  %v568_v20 = vadd.f32 %v567_v57, %v566_v49 }
 0x27d   :  { %v2677_v47 = vpop.eup %2676  ;;  %v4245_v62 = vadd.f32 %v2675_v12, %v2074_v63  ;;  %v1966_v29 = vsub.f32 %v1824_v22, %v2891_v39 }
 0x27e   :  { %v2679_v48 = vpop.eup %2678  ;;  %v2137_v32 = vadd.f32 %v2677_v47, %v4207_v60  ;;  %2690 = vtanh.f32 %v1981_v52  ;;  %v577_v60 = vadd.f32 %v4057_v13, %v576_v18  ;;  %v1583_v1 = vrot.slane %v1582_v11, 2 }
 0x27f   :  { %v2681_v37 = vpop.eup %2680  ;;  %2692 = vtanh.f32 %v1966_v29  ;;  %v1796_v0 = vpop.permute.xlu1 %1795  ;;  %v1592_v58 = vadd.f32 %v2679_v48, %v1591_v2  ;;  %v1064_v2 = vadd.f32 %v1063_v56, %v1062_v33  ;;  %v569_v53 = vrot.slane %v568_v20, 1 }
 0x280   :  { %v2683_v5 = vpop.eup %2682  ;;  %v1959_v41 = vsub.f32 %v1796_v0, %v4546_v40  ;;  %v1736_v63 = vpop.permute.xlu0 %1735  ;;  %v1073_v46 = vadd.f32 %v2681_v37, %v1072_v9  ;;  %v578_v17 = vrot.slane %v577_v60, 4  ;;  %v1584_v48 = vadd.f32 %v1583_v1, %v1582_v11 }
 0x281   :  { %v2685_v59 = vpop.eup %2684  ;;  %v4251_v31 = vadd.f32 %v2683_v5, %v2124_v27  ;;  %v1944_v38 = vsub.f32 %v1736_v63, %v4541_v19  ;;  %v1986_v9 = vsub.f32 %v4144_v6, %v4440_v30  ;;  %v1987_v63 = vsub.f32 %v4185_v21, %v4440_v30 }
 0x282   :  { %v2687_v4 = vpop.eup %2686  ;;  %v2100_v15 = vadd.f32 %v2685_v59, %v4219_v55  ;;  %2694 = vtanh.f32 %v1959_v41  ;;  %v1074_v13 = vrot.slane %v1073_v46, 4  ;;  %v579_v22 = vadd.f32 %v578_v17, %v577_v60 }
 0x283   :  { %2696 = vtanh.f32 %v1944_v38  ;;  %v4256_v28 = vpop.permute.xlu1 %1915  ;;  %v1593_v54 = vadd.f32 %v2687_v4, %v1592_v58  ;;  %v1065_v58 = vrot.slane %v1064_v2, 1  ;;  %v1585_v38 = vrot.slane %v1584_v48, 1 }
 0x284   :  { %v2689_v26 = vpop.eup %2688  ;;  %v1856_v43 = vpop.permute.xlu0 %1855  ;;  %v1075_v29 = vadd.f32 %v1074_v13, %v1073_v46  ;;  %v580_v41 = vrot.slane %v579_v22, 2  ;;  %v570_v4 = vadd.f32 %v569_v53, %v568_v20  ;;  %v1989_v21 = vsub.f32 %v4256_v28, %v4440_v30 }
 0x285   :  { %v4258_v27 = vadd.f32 %v2689_v26, %v2087_v24  ;;  %v1974_v19 = vsub.f32 %v1856_v43, %v2904_v44  ;;  %v1594_v36 = vrot.slane %v1593_v54, 4  ;;  %v1066_v43 = vadd.f32 %v1065_v58, %v1064_v2 }
 0x286   :  { %v1076_v6 = vrot.slane %v1075_v29, 2  ;;  %v581_v11 = vadd.f32 %v580_v41, %v579_v22 }
 0x287   :  { %2698 = vtanh.f32 %v1974_v19  ;;  %v1828_v55 = vpop.permute.xlu1 %1827  ;;  %v1595_v5 = vadd.f32 %v1594_v36, %v1593_v54  ;;  %v1586_v19 = vadd.f32 %v1585_v38, %v1584_v48  ;;  %v1146_v36 = vadd.f32 %v1066_v43, %v570_v4 }
 0x288   :  { %v2691_v35 = vpop.eup %2690  ;;  %v1967_v34 = vsub.f32 %v1828_v55, %v2891_v39  ;;  %v1768_v42 = vpop.permute.xlu0 %1767  ;;  %v1077_v54 = vadd.f32 %v1076_v6, %v1075_v29 }
 0x289   :  { %v2693_v12 = vpop.eup %2692  ;;  %v4262_v52 = vadd.f32 %v2691_v35, %v2137_v32  ;;  %v1952_v24 = vsub.f32 %v1768_v42, %v4501_v16  ;;  %v1985_v16 = vsub.f32 %v4123_v14, %v4440_v30  ;;  %v1988_v14 = vsub.f32 %v4236_v23, %v4440_v30 }
 0x28a   :  { %v2113_v47 = vadd.f32 %v2693_v12, %v4238_v61  ;;  %2700 = vtanh.f32 %v1967_v34  ;;  %v1596_v46 = vrot.slane %v1595_v5, 2  ;;  %v582_v12 = vrot.slane %v581_v11, 1 }
 0x28b   :  { %2702 = vtanh.f32 %v1952_v24  ;;  %v1800_v18 = vpop.permute.xlu1 %1799  ;;  %v1078_v24 = vrot.slane %v1077_v54, 1 }
 0x28c   :  { %v2695_v37 = vpop.eup %2694  ;;  %v1960_v8 = vsub.f32 %v1800_v18, %v4546_v40  ;;  %v1888_v32 = vpop.permute.xlu0 %1887  ;;  %v1597_v35 = vadd.f32 %v1596_v46, %v1595_v5 }
 0x28d   :  { %v2697_v0 = vpop.eup %2696  ;;  %v2101_v61 = vadd.f32 %v2695_v37, %v2100_v15  ;;  %v1982_v49 = vsub.f32 %v1888_v32, %v2907_v45  ;;  %v1079_v58 = vadd.f32 %v1078_v24, %v1077_v54 }
 0x28e   :  { %v2076_v59 = vadd.f32 %v2697_v0, %v4245_v62  ;;  %2704 = vtanh.f32 %v1960_v8 }
 0x28f   :  { %2706 = vtanh.f32 %v1982_v49  ;;  %v1920_v40 = vpop.permute.xlu1 %1919  ;;  %v583_v49 = vadd.f32 %v582_v12, %v581_v11 }
 0x290   :  { %2708 = vtanh.f32 %v1986_v9  ;;  %v2077_v60 = vrot.slane %v2076_v59, 4  ;;  %v1860_v15 = vpop.permute.xlu0 %1859  ;;  %v1990_v13 = vsub.f32 %v1920_v40, %v4440_v30  ;;  %v1666_v9 = vadd.f32 %v1586_v19, %v1146_v36 }
 0x291   :  { %v2699_v33 = vpop.eup %2698  ;;  %2710 = vtanh.f32 %v1985_v16  ;;  %v1975_v62 = vsub.f32 %v1860_v15, %v2904_v44 }
 0x292   :  { %2712 = vtanh.f32 %v1987_v63  ;;  %v2078_v26 = vadd.f32 %v2077_v60, %v2076_v59  ;;  %v2126_v57 = vadd.f32 %v2699_v33, %v4251_v31 }
 0x293   :  { %2714 = vtanh.f32 %v1975_v62  ;;  %v1892_v23 = vpop.permute.xlu1 %1891 }
 0x294   :  { %v2701_v17 = vpop.eup %2700  ;;  %2716 = vtanh.f32 %v1988_v14  ;;  %v2079_v56 = vrot.slane %v2078_v26, 2  ;;  %v1983_v1 = vsub.f32 %v1892_v23, %v2907_v45  ;;  %v1832_v28 = vpop.permute.xlu0 %1831 }
 0x295   :  { %v2703_v55 = vpop.eup %2702  ;;  %2718 = vtanh.f32 %v1989_v21  ;;  %v2114_v20 = vadd.f32 %v2701_v17, %v2113_v47  ;;  %v1968_v34 = vsub.f32 %v1832_v28, %v2891_v39  ;;  %v1598_v47 = vrot.slane %v1597_v35, 1 }
 0x296   :  { %v2080_v31 = vadd.f32 %v2079_v56, %v2078_v26  ;;  %v2089_v42 = vadd.f32 %v2703_v55, %v4258_v27  ;;  %2720 = vtanh.f32 %v1983_v1 }
 0x297   :  { %2722 = vtanh.f32 %v1968_v34  ;;  %v1924_v22 = vpop.permute.xlu1 %1923  ;;  %v1599_v4 = vadd.f32 %v1598_v47, %v1597_v35 }
 0x298   :  { %v2705_v2 = vpop.eup %2704  ;;  %v2081_v29 = vrot.slane %v2080_v31, 1  ;;  %v2090_v48 = vrot.slane %v2089_v42, 4  ;;  %2724 = vtanh.f32 %v1990_v13  ;;  %v1991_v18 = vsub.f32 %v1924_v22, %v4440_v30  ;;  %v1864_v37 = vpop.permute.xlu0 %1863 }
 0x299   :  { %v2707_v53 = vpop.eup %2706  ;;  %v2102_v39 = vadd.f32 %v2705_v2, %v2101_v61  ;;  %v1976_v8 = vsub.f32 %v1864_v37, %v2904_v44 }
 0x29a   :  { %v2709_v27 = vpop.eup %2708  ;;  %v2082_v32 = vadd.f32 %v2081_v29, %v2080_v31  ;;  %v2091_v0 = vadd.f32 %v2090_v48, %v2089_v42  ;;  %v2139_v5 = vadd.f32 %v2707_v53, %v4262_v52  ;;  %2726 = vtanh.f32 %v1991_v18 }
 0x29b   :  { %v2711_v16 = vpop.eup %2710  ;;  %v2103_v41 = vrot.slane %v2102_v39, 4  ;;  %2728 = vtanh.f32 %v1976_v8  ;;  %v1928_v63 = vpop.permute.xlu1 %1927 }
 0x29c   :  { %v2713_v59 = vpop.eup %2712  ;;  %v2162_v6 = vadd.f32 %v2082_v32, %v1666_v9  ;;  %v2092_v38 = vrot.slane %v2091_v0, 2  ;;  %v1992_v61 = vsub.f32 %v1928_v63, %v4440_v30  ;;  %v1896_v40 = vpop.permute.xlu0 %1895  ;;  %v2148_v14 = vadd.f32 %v2711_v16, %v2709_v27 }
 0x29d   :  { %v2715_v44 = vpop.eup %2714  ;;  %v2104_v60 = vadd.f32 %v2103_v41, %v2102_v39  ;;  %v1984_v52 = vsub.f32 %v1896_v40, %v2907_v45  ;;  %v1147_v30 = vadd.f32 %v1079_v58, %v583_v49 }
 0x29e   :  { %v2717_v15 = vpop.eup %2716  ;;  %v2093_v33 = vadd.f32 %v2092_v38, %v2091_v0  ;;  %v2127_v46 = vadd.f32 %v2715_v44, %v2126_v57  ;;  %2730 = vtanh.f32 %v1992_v61  ;;  %v2179_v21 = vsel %vm2178_vm0, %v2162_v6, %v4083_v51 }
 0x29f   :  { %v2719_v62 = vpop.eup %2718  ;;  %v2149_v11 = vadd.f32 %v2713_v59, %v2148_v14  ;;  %v2105_v26 = vrot.slane %v2104_v60, 2  ;;  %2732 = vtanh.f32 %v1984_v52  ;;  %v1667_v45 = vadd.f32 %v1599_v4, %v1147_v30 }
 0x2a0   :  { %v2721_v43 = vpop.eup %2720  ;;  %v2094_v54 = vrot.slane %v2093_v33, 1 }
 0x2a1   :  { %v2723_v19 = vpop.eup %2722  ;;  %v2150_v23 = vadd.f32 %v2717_v15, %v2149_v11  ;;  %v2106_v17 = vadd.f32 %v2105_v26, %v2104_v60  ;;  %v2140_v56 = vadd.f32 %v2721_v43, %v2139_v5 }
 0x2a2   :  { %v2725_v13 = vpop.eup %2724  ;;  %v2095_v1 = vadd.f32 %v2094_v54, %v2093_v33  ;;  %v2115_v28 = vadd.f32 %v2723_v19, %v2114_v20 }
 0x2a3   :  { %v2151_v57 = vadd.f32 %v2719_v62, %v2150_v23  ;;  %v2107_v55 = vrot.slane %v2106_v17, 1 }
 0x2a4   :  { %v2727_v35 = vpop.eup %2726  ;;  %v2163_v51 = vadd.f32 %v2095_v1, %v1667_v45  ;;  %v2116_v34 = vrot.slane %v2115_v28, 4 }
 0x2a5   :  { %v2729_v31 = vpop.eup %2728  ;;  %v2108_v42 = vadd.f32 %v2107_v55, %v2106_v17  ;;  %v2152_v12 = vadd.f32 %v2725_v13, %v2151_v57 }
 0x2a6   :  { %v2117_v36 = vadd.f32 %v2116_v34, %v2115_v28  ;;  %v2128_v24 = vadd.f32 %v2729_v31, %v2127_v46  ;;  %v2181_v22 = vsel %vm2180_vm1, %v2163_v51, %v2179_v21 }
 0x2a7   :  { %v2153_v2 = vadd.f32 %v2727_v35, %v2152_v12  ;;  %v2164_v29 = vadd.f32 %v2108_v42, %v3875_v3 }
 0x2a8   :  { %v2731_v48 = vpop.eup %2730  ;;  %v2118_v18 = vrot.slane %v2117_v36, 2  ;;  %v2129_v37 = vrot.slane %v2128_v24, 4 }
 0x2a9   :  { %v2733_v20 = vpop.eup %2732  ;;  %v2154_v53 = vadd.f32 %v2731_v48, %v2153_v2  ;;  %v2183_v47 = vsel %vm2182_vm2, %v2164_v29, %v2181_v22 }
 0x2aa   :  { %v2119_v9 = vadd.f32 %v2118_v18, %v2117_v36  ;;  %v2130_v39 = vadd.f32 %v2129_v37, %v2128_v24  ;;  %v2141_v8 = vadd.f32 %v2733_v20, %v2140_v56 }
 0x2ab   :  { %v2155_v27 = vrot.slane %v2154_v53, 4 }
 0x2ac   :  { %v2120_v32 = vrot.slane %v2119_v9, 1  ;;  %v2131_v0 = vrot.slane %v2130_v39, 2  ;;  %v2142_v5 = vrot.slane %v2141_v8, 4 }
 0x2ad   :  { %v2156_v16 = vadd.f32 %v2155_v27, %v2154_v53 }
 0x2ae   :  { %v2132_v49 = vadd.f32 %v2131_v0, %v2130_v39  ;;  %v2143_v41 = vadd.f32 %v2142_v5, %v2141_v8  ;;  %v2121_v63 = vadd.f32 %v2120_v32, %v2119_v9 }
 0x2af   :  { %v2157_v59 = vrot.slane %v2156_v16, 2 }
 0x2b0   :  { %v2144_v3 = vrot.slane %v2143_v41, 2  ;;  %v2133_v58 = vrot.slane %v2132_v49, 1  ;;  %v2165_v6 = vadd.f32 %v2121_v63, %v3929_v50 }
 0x2b1   :  { %v2158_v38 = vadd.f32 %v2157_v59, %v2156_v16 }
 0x2b2   :  { %v2134_v61 = vadd.f32 %v2133_v58, %v2132_v49  ;;  %v2145_v40 = vadd.f32 %v2144_v3, %v2143_v41  ;;  %v2185_v44 = vsel %vm2184_vm3, %v2165_v6, %v2183_v47 }
 0x2b3   :  { %v2159_v4 = vrot.slane %v2158_v38, 1 }
 0x2b4   :  { %v2146_v14 = vrot.slane %v2145_v40, 1  ;;  %v2166_v60 = vadd.f32 %v2134_v61, %v3977_v7 }
 0x2b5   :  { %v2160_v52 = vadd.f32 %v2159_v4, %v2158_v38 }
 0x2b6   :  { %v2147_v15 = vadd.f32 %v2146_v14, %v2145_v40  ;;  %v2187_v33 = vsel %vm2186_vm4, %v2166_v60, %v2185_v44 }
 0x2b7   :  { %v2168_v46 = vadd.f32 %v2160_v52, %v4049_v25 }
 0x2b8   :  { %v2167_v21 = vadd.f32 %v2147_v15, %v4018_v10 }
 0x2ba   :  { %v2189_v62 = vsel %vm2188_vm5, %v2167_v21, %v2187_v33 }
 0x2bb   :  { %v2191_v50 = vsel %vm2190_vm6, %v2168_v46, %v2189_v62 }
 0x2bc   :  { %v2199_v11 = vmul.f32 0.5, %v2191_v50 }
 0x2be   :  { %v2200_v26 = vadd.f32 128.5, %v2199_v11 }
 0x2c0   :  { %2201 = vst [vmem:[#allocation8] sm:$0xff] %v2200_v26 }
 0x2c1   :  { %2789 = shalt.err (!%p2786_p6)
}
 0x2c2   :  { %s2790_s8 = scalar_lea.hbm %s4311_s2, 128 }
 0x2c3   :  { %p2791_p7 = scmp.ne.s32.totalorder %s4311_s2, %s2790_s8  ;;  %p2794_p8 = scmp.lt.u32.totalorder %s2790_s8, %s4311_s2 }
 0x2c5   :  { %p2796_p9 = pnand %p2794_p8, %p2791_p7 }
 0x2c7   :  { %2799 = shalt.err (!%p2796_p9)
}
 0x2c8   :  { %2211 = dma.vmem_to_hbm [thread:$0]  %s2209_s4, 128, %s4311_s2, [#allocation5]  }
 0x2c9   :  { %2804 = dma.done.wait [#allocation5], 128  }
 0x2ca   :  { %2805 = vsyncadd [#allocation5], 4294967168 }
 0x2cb   :  { %2215 = vsyncpa [#allocation4], 1 }
 0x2cc   :  { %2216 = vsyncpa [#allocation7], 1 }
 0x2cd   :  { %2217 = vsyncpa [#allocation5], 1 }

</bundles_post_ra>
